<compile_context>
chip_gen: v5e
topology: v5e:2x2
jax: 0.10.0
libtpu: 0.0.40
codegen_flags: <defaults>
</compile_context>

<pallas_src>
import functools

import jax
import jax.numpy as jnp
from jax.experimental import pallas as pl
from jax.experimental.pallas import tpu as pltpu

CHUNK_ROWS = 8                                # sublanes per compute tile
LANES = 256                                   # lanes per compute tile
EDGES_PER_CHUNK = CHUNK_ROWS * LANES          # 2048 edges per chunk
MAX_CHUNKS_PER_BLOCK = 16                     # <= 32768 edges per grid step

MV_COEF = 1.0
LINEBASE_COEF = 2.0

# Packed parameter layout, one (8, 21) f32 array held in SMEM:
#   cols 0:2   lin1[0].weight (8, 2)     col 2   lin1[0].bias
#   cols 3:11  lin1[2].weight (8, 8)     col 11  lin1[2].bias
#   cols 12:20 lin1[4].weight (8, 8)     col 20  lin1[4].bias


# --------------------------------------------------------------------------
# cbrt lowering probe (lax.cbrt may not be lowerable on every jax version)
# --------------------------------------------------------------------------
_CBRT_SUPPORTED = None


def _cbrt_in_kernel_supported():
    global _CBRT_SUPPORTED
    if _CBRT_SUPPORTED is None:
        def _probe(x_ref, o_ref):
            o_ref[...] = jax.lax.cbrt(x_ref[...])

        try:
            x = jnp.full((8, 128), 8.0, dtype=jnp.float32)
            y = pl.pallas_call(
                _probe, out_shape=jax.ShapeDtypeStruct((8, 128), jnp.float32)
            )(x)
            y = jax.block_until_ready(y)
            _CBRT_SUPPORTED = bool(jnp.allclose(y, 2.0, rtol=1e-5, atol=1e-5))
        except Exception:  # any lowering / compile failure -> pow fallback
            _CBRT_SUPPORTED = False
    return _CBRT_SUPPORTED


# --------------------------------------------------------------------------
# kernel
# --------------------------------------------------------------------------
def _mlp_and_pot(params_ref, cen, nei, r, r0, use_cbrt):
    """Per-chunk Morse potential on (8, LANES) tiles.  Weights from SMEM."""
    p0 = nei + cen
    p1 = nei * cen

    # lin1[0]: 2 -> 8, ReLU   (unrolled VPU broadcast-FMA)
    h1 = []
    for o in range(8):
        a = params_ref[o, 0] * p0 + params_ref[o, 1] * p1 + params_ref[o, 2]
        h1.append(jnp.maximum(a, 0.0))

    # lin1[2]: 8 -> 8, ReLU
    h2 = []
    for o in range(8):
        a = params_ref[o, 3] * h1[0]
        for t in range(1, 8):
            a = a + params_ref[o, 3 + t] * h1[t]
        h2.append(jnp.maximum(a + params_ref[o, 11], 0.0))

    # lin1[4]: 8 -> 8   (channel 7 is unused by the module)
    h3 = []
    for o in range(7):
        a = params_ref[o, 12] * h2[0]
        for t in range(1, 8):
            a = a + params_ref[o, 12 + t] * h2[t]
        h3.append(a + params_ref[o, 20])

    D = jnp.abs(h3[0])
    k = jnp.minimum(jnp.abs(h3[1]), 20.0)
    c = h3[2]
    alpha = jnp.clip(h3[3], -20.0, 20.0)
    n_3 = 0.001 * h3[4]
    n1 = 0.001 * jnp.abs(h3[5])
    n2 = 0.001 * h3[6]

    alpha = (1.0 + 0.01 * alpha) * MV_COEF
    k = (0.8 + 0.01 * k) * LINEBASE_COEF

    core = -k * (r - alpha * r0)
    om = 1.0 - jnp.exp(core)
    if use_cbrt:
        r_13 = jax.lax.cbrt(r)          # single EUP transcendental
    else:
        r_13 = r ** (1.0 / 3.0)         # pow fallback (exp(log(x)/3))
    pot = D * (om * om) + n_3 * r_13 + n2 * (r * r)
    pot = jnp.minimum(pot, 10.0)
    pot = pot - n1 * r + c
    return pot


def _make_morse_kernel(xyz, use_cbrt):
    if xyz:
        def kernel(cen_ref, nei_ref, r0_ref, vx_ref, vy_ref, vz_ref,
                   params_ref, ox_ref, oy_ref, oz_ref):
            def chunk(ci, carry):
                vx = vx_ref[ci]
                vy = vy_ref[ci]
                vz = vz_ref[ci]
                r = vx * vx + vy * vy + vz * vz     # |v|^2 (module semantics)
                pot = _mlp_and_pot(params_ref, cen_ref[ci], nei_ref[ci],
                                   r, r0_ref[ci], use_cbrt)
                s = pot / r                         # beta = v*|v| / |v|^2
                ox_ref[ci] = (vx * jnp.abs(vx)) * s
                oy_ref[ci] = (vy * jnp.abs(vy)) * s
                oz_ref[ci] = (vz * jnp.abs(vz)) * s
                return carry

            jax.lax.fori_loop(0, ox_ref.shape[0], chunk, 0)
        return kernel

    def kernel(cen_ref, nei_ref, r0_ref, r_ref, params_ref, out_ref):
        def chunk(ci, carry):
            out_ref[ci] = _mlp_and_pot(params_ref, cen_ref[ci], nei_ref[ci],
                                       r_ref[ci], r0_ref[ci], use_cbrt)
            return carry

        jax.lax.fori_loop(0, out_ref.shape[0], chunk, 0)
    return kernel


# --------------------------------------------------------------------------
# host-side packing / dispatch
# --------------------------------------------------------------------------
def _grid_dims(n_edges):
    n_chunks = max(1, pl.cdiv(n_edges, EDGES_PER_CHUNK))
    # >= 2 grid steps when there is enough work (two v7x TensorCores), and at
    # most MAX_CHUNKS_PER_BLOCK chunks per step.
    target_steps = max(2, pl.cdiv(n_chunks, MAX_CHUNKS_PER_BLOCK))
    bc = pl.cdiv(n_chunks, target_steps)
    n_chunks_pad = pl.cdiv(n_chunks, bc) * bc
    return n_chunks_pad, bc


def _pack_chunks(x, n_chunks_pad):
    """(N,) -> (n_chunks_pad, 8, LANES) f32, padded with 1.0 (keeps math finite)."""
    n = x.shape[0]
    total = n_chunks_pad * EDGES_PER_CHUNK
    x = jnp.pad(x.astype(jnp.float32), (0, total - n), constant_values=1.0)
    return x.reshape(n_chunks_pad, CHUNK_ROWS, LANES)


def _pack_params(params):
    w1, b1, w2, b2, w3, b3 = params
    return jnp.concatenate(
        [w1.reshape(8, 2), b1.reshape(8, 1),
         w2.reshape(8, 8), b2.reshape(8, 1),
         w3.reshape(8, 8), b3.reshape(8, 1)], axis=1).astype(jnp.float32)


@functools.partial(jax.jit, static_argnames=("xyz", "use_cbrt"))
def _morse_pallas(params, radii, cen, nei, r_or_vec, *, xyz, use_cbrt):
    cen = cen.reshape(-1)
    nei = nei.reshape(-1)
    n = cen.shape[0]
    # Tiny table gather stays in XLA glue.
    r0 = (radii[nei] + radii[cen]).astype(jnp.float32)

    n_chunks_pad, bc = _grid_dims(n)
    grid = n_chunks_pad // bc

    chans = [cen.astype(jnp.float32), nei.astype(jnp.float32), r0]
    if xyz:
        v = r_or_vec.astype(jnp.float32)
        chans += [v[:, 0], v[:, 1], v[:, 2]]
    else:
        chans.append(r_or_vec.reshape(-1).astype(jnp.float32))
    n_ch = len(chans)

    packed_chans = [_pack_chunks(ch, n_chunks_pad) for ch in chans]
    packed_params = _pack_params(params)

    chan_spec = pl.BlockSpec((bc, CHUNK_ROWS, LANES), lambda i: (i, 0, 0))
    smem_spec = pl.BlockSpec(memory_space=pltpu.MemorySpace.SMEM)

    kernel = _make_morse_kernel(xyz, use_cbrt)

    if xyz:
        out_shape = tuple(
            jax.ShapeDtypeStruct((n_chunks_pad, CHUNK_ROWS, LANES), jnp.float32)
            for _ in range(3))
        out_specs = [chan_spec, chan_spec, chan_spec]
    else:
        out_shape = jax.ShapeDtypeStruct((n_chunks_pad, CHUNK_ROWS, LANES),
                                         jnp.float32)
        out_specs = chan_spec

    outs = pl.pallas_call(
        kernel,
        out_shape=out_shape,
        grid_spec=pltpu.PrefetchScalarGridSpec(
            num_scalar_prefetch=0,
            grid=(grid,),
            in_specs=[chan_spec] * n_ch + [smem_spec],
            out_specs=out_specs,
        ),
        compiler_params=pltpu.CompilerParams(
            dimension_semantics=("parallel",),
        ),
    )(*packed_chans, packed_params)

    if xyz:
        return jnp.stack([o.reshape(-1)[:n] for o in outs], axis=1)
    return outs.reshape(-1)[:n].reshape(n, 1)


# --------------------------------------------------------------------------
# pure-JAX reference (mirrors the PyTorch module) — also the small-N fast path
# --------------------------------------------------------------------------
def _morse_r_ref(params, radii, cen, nei, r):
    w1, b1, w2, b2, w3, b3 = params
    cen = cen.reshape(-1)
    nei = nei.reshape(-1)
    r = r.reshape(-1, 1).astype(jnp.float32)
    r0 = (radii[nei] + radii[cen]).astype(jnp.float32).reshape(-1, 1)
    pin = jnp.stack([(nei + cen).astype(jnp.float32),
                     (nei * cen).astype(jnp.float32)], axis=1)
    hp = jax.lax.Precision.HIGHEST
    h = jnp.maximum(jnp.dot(pin, w1.T, precision=hp) + b1, 0.0)
    h = jnp.maximum(jnp.dot(h, w2.T, precision=hp) + b2, 0.0)
    h = jnp.dot(h, w3.T, precision=hp) + b3
    D = jnp.abs(h[:, 0:1]); k = jnp.abs(h[:, 1:2]); c = h[:, 2:3]
    alpha = h[:, 3:4]; n_3 = 0.001 * h[:, 4:5]
    n1 = 0.001 * jnp.abs(h[:, 5:6]); n2 = 0.001 * h[:, 6:7]
    alpha = jnp.clip(alpha, -20.0, 20.0)
    k = jnp.minimum(k, 20.0)
    alpha = (1.0 + 0.01 * alpha) * MV_COEF
    k = (0.8 + 0.01 * k) * LINEBASE_COEF
    core = -k * (r - alpha * r0)
    pot = D * (1.0 - jnp.exp(core)) ** 2 + n_3 * r ** (1.0 / 3.0) + n2 * r ** 2
    pot = jnp.minimum(pot, 10.0)
    return pot - n1 * r + c


def morse_forward(params, radii, cen, nei, r, *, min_pallas_edges=1024):
    """Mirrors Morse.forward: r is (N,), (N,1) distances or (N,3) vectors."""
    cen = cen.reshape(-1)
    nei = nei.reshape(-1)
    n = cen.shape[0]
    use_cbrt = _cbrt_in_kernel_supported()

    if r.ndim == 1 or (r.ndim == 2 and r.shape[1] == 1):
        if n < min_pallas_edges:
            return _morse_r_ref(params, radii, cen, nei, r)
        return _morse_pallas(params, radii, cen, nei, r,
                             xyz=False, use_cbrt=use_cbrt)
    elif r.ndim == 2 and r.shape[1] == 3:
        if n < min_pallas_edges:
            r1 = jnp.sum(r * r, axis=1, keepdims=True)
            pot = _morse_r_ref(params, radii, cen, nei, r1)
            return (r * jnp.abs(r) / r1) * pot
        return _morse_pallas(params, radii, cen, nei, r,
                             xyz=True, use_cbrt=use_cbrt)
    else:
        raise NotImplementedError(
            "r are just accept distance (N,) or (N,1) or distance_vec (N,3)")


# --------------------------------------------------------------------------
# parameter init (stand-in for nn.Linear(2,8)->ReLU->Linear(8,8)->ReLU->Linear(8,8))
# --------------------------------------------------------------------------
def init_params(key):
    ks = jax.random.split(key, 6)

    def lin(kw, kb, fan_in, fan_out):
        bound = 1.0 / jnp.sqrt(fan_in)
        w = jax.random.uniform(kw, (fan_out, fan_in), jnp.float32, -bound, bound)
        b = jax.random.uniform(kb, (fan_out,), jnp.float32, -bound, bound)
        return w, b

    w1, b1 = lin(ks[0], ks[1], 2, 8)
    w2, b2 = lin(ks[2], ks[3], 8, 8)
    w3, b3 = lin(ks[4], ks[5], 8, 8)
    return (w1, b1, w2, b2, w3, b3)


if __name__ == "__main__":
    key = jax.random.PRNGKey(0)
    k_par, k_rad, k_cen, k_nei, k_r, k_vec, k_sgn = jax.random.split(key, 7)

    params = init_params(k_par)
    # TODO(synk): ase.data.covalent_radii not bundled; deterministic synthetic radii table (119 entries).
    radii = jax.random.uniform(k_rad, (119,), jnp.float32, 0.3, 1.2)

    # ---- Pallas path (both branches): enough edges for a multi-step grid ----
    N = 12000
    cen = jax.random.randint(k_cen, (N,), 1, 20, dtype=jnp.int32)
    nei = jax.random.randint(k_nei, (N,), 1, 20, dtype=jnp.int32)
    r = jax.random.uniform(k_r, (N, 1), jnp.float32, 3.0, 6.0)
    signs = jnp.where(jax.random.bernoulli(k_sgn, 0.5, (N, 3)), 1.0, -1.0)
    r_vec = jax.random.uniform(k_vec, (N, 3), jnp.float32, 1.0, 2.0) * signs

    pot = jax.block_until_ready(morse_forward(params, radii, cen, nei, r))
    ref = _morse_r_ref(params, radii, cen, nei, r)
    assert pot.shape == (N, 1)
    assert jnp.allclose(pot, ref, rtol=1e-3, atol=1e-2), \
        float(jnp.max(jnp.abs(pot - ref)))

    pot_xyz = jax.block_until_ready(morse_forward(params, radii, cen, nei, r_vec))
    r1 = jnp.sum(r_vec ** 2, axis=1, keepdims=True)
    ref_xyz = (r_vec * jnp.abs(r_vec) / r1) * _morse_r_ref(params, radii, cen, nei, r1)
    assert pot_xyz.shape == (N, 3)
    assert jnp.allclose(pot_xyz, ref_xyz, rtol=1e-3, atol=1e-2), \
        float(jnp.max(jnp.abs(pot_xyz - ref_xyz)))

    # ---- small-N fast path (pure-JAX fallback) ----
    Ns = 8
    pot_s = jax.block_until_ready(
        morse_forward(params, radii, cen[:Ns], nei[:Ns], r[:Ns]))
    assert pot_s.shape == (Ns, 1)
    assert jnp.allclose(pot_s,
                        _morse_r_ref(params, radii, cen[:Ns], nei[:Ns], r[:Ns]),
                        rtol=1e-5, atol=1e-5)

    print("KERNEL_OK")
</pallas_src>

<mosaic_0001>
module attributes {stable_mosaic.version = 11 : i64} {
  func.func @kernel(%arg0: i32, %arg1: memref<3x8x256xf32, #tpu.memory_space<vmem>>, %arg2: memref<3x8x256xf32, #tpu.memory_space<vmem>>, %arg3: memref<3x8x256xf32, #tpu.memory_space<vmem>>, %arg4: memref<3x8x256xf32, #tpu.memory_space<vmem>>, %arg5: memref<8x21xf32, #tpu.memory_space<smem>>, %arg6: memref<3x8x256xf32, #tpu.memory_space<vmem>>) attributes {dimension_semantics = [#tpu.dimension_semantics<parallel>], iteration_bounds = array<i64: 2>, scalar_prefetch = 0 : i64, scratch_operands = 0 : i64, tpu.core_type = #tpu.core_type<tc>, window_params = [{transform_indices = @transform_0, window_bounds = array<i64: 3, 8, 256>}, {transform_indices = @transform_1, window_bounds = array<i64: 3, 8, 256>}, {transform_indices = @transform_2, window_bounds = array<i64: 3, 8, 256>}, {transform_indices = @transform_3, window_bounds = array<i64: 3, 8, 256>}, {transform_indices = @transform_4, window_bounds = array<i64: 8, 21>}, {transform_indices = @transform_5, window_bounds = array<i64: 3, 8, 256>}]} {
    %c0_i32 = arith.constant 0 : i32
    %c3_i32 = arith.constant 3 : i32
    %0 = arith.addi %c0_i32, %c3_i32 : i32
    %c1_i32 = arith.constant 1 : i32
    scf.for %arg7 = %c0_i32 to %0 step %c1_i32  : i32 {
      %1 = arith.index_cast %arg7 : i32 to index
      %c0 = arith.constant 0 : index
      %c0_1 = arith.constant 0 : index
      %2 = vector.load %arg1[%1, %c0, %c0_1] : memref<3x8x256xf32, #tpu.memory_space<vmem>>, vector<1x8x256xf32>
      %3 = vector.shape_cast %2 : vector<1x8x256xf32> to vector<8x256xf32>
      %4 = arith.index_cast %arg7 : i32 to index
      %c0_2 = arith.constant 0 : index
      %c0_3 = arith.constant 0 : index
      %5 = vector.load %arg2[%4, %c0_2, %c0_3] : memref<3x8x256xf32, #tpu.memory_space<vmem>>, vector<1x8x256xf32>
      %6 = vector.shape_cast %5 : vector<1x8x256xf32> to vector<8x256xf32>
      %7 = arith.index_cast %arg7 : i32 to index
      %c0_4 = arith.constant 0 : index
      %c0_5 = arith.constant 0 : index
      %8 = vector.load %arg4[%7, %c0_4, %c0_5] : memref<3x8x256xf32, #tpu.memory_space<vmem>>, vector<1x8x256xf32>
      %9 = vector.shape_cast %8 : vector<1x8x256xf32> to vector<8x256xf32>
      %10 = arith.index_cast %arg7 : i32 to index
      %c0_6 = arith.constant 0 : index
      %c0_7 = arith.constant 0 : index
      %11 = vector.load %arg3[%10, %c0_6, %c0_7] : memref<3x8x256xf32, #tpu.memory_space<vmem>>, vector<1x8x256xf32>
      %12 = vector.shape_cast %11 : vector<1x8x256xf32> to vector<8x256xf32>
      %13 = arith.addf %6, %3 : vector<8x256xf32>
      %14 = arith.mulf %6, %3 : vector<8x256xf32>
      %c0_8 = arith.constant 0 : index
      %c0_9 = arith.constant 0 : index
      %15 = memref.load %arg5[%c0_8, %c0_9] : memref<8x21xf32, #tpu.memory_space<smem>>
      %16 = vector.broadcast %15 : f32 to vector<8x256xf32>
      %17 = arith.mulf %16, %13 : vector<8x256xf32>
      %c0_10 = arith.constant 0 : index
      %c1 = arith.constant 1 : index
      %18 = memref.load %arg5[%c0_10, %c1] : memref<8x21xf32, #tpu.memory_space<smem>>
      %19 = vector.broadcast %18 : f32 to vector<8x256xf32>
      %20 = arith.mulf %19, %14 : vector<8x256xf32>
      %21 = arith.addf %17, %20 : vector<8x256xf32>
      %c0_11 = arith.constant 0 : index
      %c2 = arith.constant 2 : index
      %22 = memref.load %arg5[%c0_11, %c2] : memref<8x21xf32, #tpu.memory_space<smem>>
      %23 = vector.broadcast %22 : f32 to vector<8x256xf32>
      %24 = arith.addf %21, %23 : vector<8x256xf32>
      %cst = arith.constant 0.000000e+00 : f32
      %25 = vector.broadcast %cst : f32 to vector<8x256xf32>
      %26 = arith.maximumf %24, %25 : vector<8x256xf32>
      %c1_12 = arith.constant 1 : index
      %c0_13 = arith.constant 0 : index
      %27 = memref.load %arg5[%c1_12, %c0_13] : memref<8x21xf32, #tpu.memory_space<smem>>
      %28 = vector.broadcast %27 : f32 to vector<8x256xf32>
      %29 = arith.mulf %28, %13 : vector<8x256xf32>
      %c1_14 = arith.constant 1 : index
      %c1_15 = arith.constant 1 : index
      %30 = memref.load %arg5[%c1_14, %c1_15] : memref<8x21xf32, #tpu.memory_space<smem>>
      %31 = vector.broadcast %30 : f32 to vector<8x256xf32>
      %32 = arith.mulf %31, %14 : vector<8x256xf32>
      %33 = arith.addf %29, %32 : vector<8x256xf32>
      %c1_16 = arith.constant 1 : index
      %c2_17 = arith.constant 2 : index
      %34 = memref.load %arg5[%c1_16, %c2_17] : memref<8x21xf32, #tpu.memory_space<smem>>
      %35 = vector.broadcast %34 : f32 to vector<8x256xf32>
      %36 = arith.addf %33, %35 : vector<8x256xf32>
      %cst_18 = arith.constant 0.000000e+00 : f32
      %37 = vector.broadcast %cst_18 : f32 to vector<8x256xf32>
      %38 = arith.maximumf %36, %37 : vector<8x256xf32>
      %c2_19 = arith.constant 2 : index
      %c0_20 = arith.constant 0 : index
      %39 = memref.load %arg5[%c2_19, %c0_20] : memref<8x21xf32, #tpu.memory_space<smem>>
      %40 = vector.broadcast %39 : f32 to vector<8x256xf32>
      %41 = arith.mulf %40, %13 : vector<8x256xf32>
      %c2_21 = arith.constant 2 : index
      %c1_22 = arith.constant 1 : index
      %42 = memref.load %arg5[%c2_21, %c1_22] : memref<8x21xf32, #tpu.memory_space<smem>>
      %43 = vector.broadcast %42 : f32 to vector<8x256xf32>
      %44 = arith.mulf %43, %14 : vector<8x256xf32>
      %45 = arith.addf %41, %44 : vector<8x256xf32>
      %c2_23 = arith.constant 2 : index
      %c2_24 = arith.constant 2 : index
      %46 = memref.load %arg5[%c2_23, %c2_24] : memref<8x21xf32, #tpu.memory_space<smem>>
      %47 = vector.broadcast %46 : f32 to vector<8x256xf32>
      %48 = arith.addf %45, %47 : vector<8x256xf32>
      %cst_25 = arith.constant 0.000000e+00 : f32
      %49 = vector.broadcast %cst_25 : f32 to vector<8x256xf32>
      %50 = arith.maximumf %48, %49 : vector<8x256xf32>
      %c3 = arith.constant 3 : index
      %c0_26 = arith.constant 0 : index
      %51 = memref.load %arg5[%c3, %c0_26] : memref<8x21xf32, #tpu.memory_space<smem>>
      %52 = vector.broadcast %51 : f32 to vector<8x256xf32>
      %53 = arith.mulf %52, %13 : vector<8x256xf32>
      %c3_27 = arith.constant 3 : index
      %c1_28 = arith.constant 1 : index
      %54 = memref.load %arg5[%c3_27, %c1_28] : memref<8x21xf32, #tpu.memory_space<smem>>
      %55 = vector.broadcast %54 : f32 to vector<8x256xf32>
      %56 = arith.mulf %55, %14 : vector<8x256xf32>
      %57 = arith.addf %53, %56 : vector<8x256xf32>
      %c3_29 = arith.constant 3 : index
      %c2_30 = arith.constant 2 : index
      %58 = memref.load %arg5[%c3_29, %c2_30] : memref<8x21xf32, #tpu.memory_space<smem>>
      %59 = vector.broadcast %58 : f32 to vector<8x256xf32>
      %60 = arith.addf %57, %59 : vector<8x256xf32>
      %cst_31 = arith.constant 0.000000e+00 : f32
      %61 = vector.broadcast %cst_31 : f32 to vector<8x256xf32>
      %62 = arith.maximumf %60, %61 : vector<8x256xf32>
      %c4 = arith.constant 4 : index
      %c0_32 = arith.constant 0 : index
      %63 = memref.load %arg5[%c4, %c0_32] : memref<8x21xf32, #tpu.memory_space<smem>>
      %64 = vector.broadcast %63 : f32 to vector<8x256xf32>
      %65 = arith.mulf %64, %13 : vector<8x256xf32>
      %c4_33 = arith.constant 4 : index
      %c1_34 = arith.constant 1 : index
      %66 = memref.load %arg5[%c4_33, %c1_34] : memref<8x21xf32, #tpu.memory_space<smem>>
      %67 = vector.broadcast %66 : f32 to vector<8x256xf32>
      %68 = arith.mulf %67, %14 : vector<8x256xf32>
      %69 = arith.addf %65, %68 : vector<8x256xf32>
      %c4_35 = arith.constant 4 : index
      %c2_36 = arith.constant 2 : index
      %70 = memref.load %arg5[%c4_35, %c2_36] : memref<8x21xf32, #tpu.memory_space<smem>>
      %71 = vector.broadcast %70 : f32 to vector<8x256xf32>
      %72 = arith.addf %69, %71 : vector<8x256xf32>
      %cst_37 = arith.constant 0.000000e+00 : f32
      %73 = vector.broadcast %cst_37 : f32 to vector<8x256xf32>
      %74 = arith.maximumf %72, %73 : vector<8x256xf32>
      %c5 = arith.constant 5 : index
      %c0_38 = arith.constant 0 : index
      %75 = memref.load %arg5[%c5, %c0_38] : memref<8x21xf32, #tpu.memory_space<smem>>
      %76 = vector.broadcast %75 : f32 to vector<8x256xf32>
      %77 = arith.mulf %76, %13 : vector<8x256xf32>
      %c5_39 = arith.constant 5 : index
      %c1_40 = arith.constant 1 : index
      %78 = memref.load %arg5[%c5_39, %c1_40] : memref<8x21xf32, #tpu.memory_space<smem>>
      %79 = vector.broadcast %78 : f32 to vector<8x256xf32>
      %80 = arith.mulf %79, %14 : vector<8x256xf32>
      %81 = arith.addf %77, %80 : vector<8x256xf32>
      %c5_41 = arith.constant 5 : index
      %c2_42 = arith.constant 2 : index
      %82 = memref.load %arg5[%c5_41, %c2_42] : memref<8x21xf32, #tpu.memory_space<smem>>
      %83 = vector.broadcast %82 : f32 to vector<8x256xf32>
      %84 = arith.addf %81, %83 : vector<8x256xf32>
      %cst_43 = arith.constant 0.000000e+00 : f32
      %85 = vector.broadcast %cst_43 : f32 to vector<8x256xf32>
      %86 = arith.maximumf %84, %85 : vector<8x256xf32>
      %c6 = arith.constant 6 : index
      %c0_44 = arith.constant 0 : index
      %87 = memref.load %arg5[%c6, %c0_44] : memref<8x21xf32, #tpu.memory_space<smem>>
      %88 = vector.broadcast %87 : f32 to vector<8x256xf32>
      %89 = arith.mulf %88, %13 : vector<8x256xf32>
      %c6_45 = arith.constant 6 : index
      %c1_46 = arith.constant 1 : index
      %90 = memref.load %arg5[%c6_45, %c1_46] : memref<8x21xf32, #tpu.memory_space<smem>>
      %91 = vector.broadcast %90 : f32 to vector<8x256xf32>
      %92 = arith.mulf %91, %14 : vector<8x256xf32>
      %93 = arith.addf %89, %92 : vector<8x256xf32>
      %c6_47 = arith.constant 6 : index
      %c2_48 = arith.constant 2 : index
      %94 = memref.load %arg5[%c6_47, %c2_48] : memref<8x21xf32, #tpu.memory_space<smem>>
      %95 = vector.broadcast %94 : f32 to vector<8x256xf32>
      %96 = arith.addf %93, %95 : vector<8x256xf32>
      %cst_49 = arith.constant 0.000000e+00 : f32
      %97 = vector.broadcast %cst_49 : f32 to vector<8x256xf32>
      %98 = arith.maximumf %96, %97 : vector<8x256xf32>
      %c7 = arith.constant 7 : index
      %c0_50 = arith.constant 0 : index
      %99 = memref.load %arg5[%c7, %c0_50] : memref<8x21xf32, #tpu.memory_space<smem>>
      %100 = vector.broadcast %99 : f32 to vector<8x256xf32>
      %101 = arith.mulf %100, %13 : vector<8x256xf32>
      %c7_51 = arith.constant 7 : index
      %c1_52 = arith.constant 1 : index
      %102 = memref.load %arg5[%c7_51, %c1_52] : memref<8x21xf32, #tpu.memory_space<smem>>
      %103 = vector.broadcast %102 : f32 to vector<8x256xf32>
      %104 = arith.mulf %103, %14 : vector<8x256xf32>
      %105 = arith.addf %101, %104 : vector<8x256xf32>
      %c7_53 = arith.constant 7 : index
      %c2_54 = arith.constant 2 : index
      %106 = memref.load %arg5[%c7_53, %c2_54] : memref<8x21xf32, #tpu.memory_space<smem>>
      %107 = vector.broadcast %106 : f32 to vector<8x256xf32>
      %108 = arith.addf %105, %107 : vector<8x256xf32>
      %cst_55 = arith.constant 0.000000e+00 : f32
      %109 = vector.broadcast %cst_55 : f32 to vector<8x256xf32>
      %110 = arith.maximumf %108, %109 : vector<8x256xf32>
      %c0_56 = arith.constant 0 : index
      %c3_57 = arith.constant 3 : index
      %111 = memref.load %arg5[%c0_56, %c3_57] : memref<8x21xf32, #tpu.memory_space<smem>>
      %112 = vector.broadcast %111 : f32 to vector<8x256xf32>
      %113 = arith.mulf %112, %26 : vector<8x256xf32>
      %c0_58 = arith.constant 0 : index
      %c4_59 = arith.constant 4 : index
      %114 = memref.load %arg5[%c0_58, %c4_59] : memref<8x21xf32, #tpu.memory_space<smem>>
      %115 = vector.broadcast %114 : f32 to vector<8x256xf32>
      %116 = arith.mulf %115, %38 : vector<8x256xf32>
      %117 = arith.addf %113, %116 : vector<8x256xf32>
      %c0_60 = arith.constant 0 : index
      %c5_61 = arith.constant 5 : index
      %118 = memref.load %arg5[%c0_60, %c5_61] : memref<8x21xf32, #tpu.memory_space<smem>>
      %119 = vector.broadcast %118 : f32 to vector<8x256xf32>
      %120 = arith.mulf %119, %50 : vector<8x256xf32>
      %121 = arith.addf %117, %120 : vector<8x256xf32>
      %c0_62 = arith.constant 0 : index
      %c6_63 = arith.constant 6 : index
      %122 = memref.load %arg5[%c0_62, %c6_63] : memref<8x21xf32, #tpu.memory_space<smem>>
      %123 = vector.broadcast %122 : f32 to vector<8x256xf32>
      %124 = arith.mulf %123, %62 : vector<8x256xf32>
      %125 = arith.addf %121, %124 : vector<8x256xf32>
      %c0_64 = arith.constant 0 : index
      %c7_65 = arith.constant 7 : index
      %126 = memref.load %arg5[%c0_64, %c7_65] : memref<8x21xf32, #tpu.memory_space<smem>>
      %127 = vector.broadcast %126 : f32 to vector<8x256xf32>
      %128 = arith.mulf %127, %74 : vector<8x256xf32>
      %129 = arith.addf %125, %128 : vector<8x256xf32>
      %c0_66 = arith.constant 0 : index
      %c8 = arith.constant 8 : index
      %130 = memref.load %arg5[%c0_66, %c8] : memref<8x21xf32, #tpu.memory_space<smem>>
      %131 = vector.broadcast %130 : f32 to vector<8x256xf32>
      %132 = arith.mulf %131, %86 : vector<8x256xf32>
      %133 = arith.addf %129, %132 : vector<8x256xf32>
      %c0_67 = arith.constant 0 : index
      %c9 = arith.constant 9 : index
      %134 = memref.load %arg5[%c0_67, %c9] : memref<8x21xf32, #tpu.memory_space<smem>>
      %135 = vector.broadcast %134 : f32 to vector<8x256xf32>
      %136 = arith.mulf %135, %98 : vector<8x256xf32>
      %137 = arith.addf %133, %136 : vector<8x256xf32>
      %c0_68 = arith.constant 0 : index
      %c10 = arith.constant 10 : index
      %138 = memref.load %arg5[%c0_68, %c10] : memref<8x21xf32, #tpu.memory_space<smem>>
      %139 = vector.broadcast %138 : f32 to vector<8x256xf32>
      %140 = arith.mulf %139, %110 : vector<8x256xf32>
      %141 = arith.addf %137, %140 : vector<8x256xf32>
      %c0_69 = arith.constant 0 : index
      %c11 = arith.constant 11 : index
      %142 = memref.load %arg5[%c0_69, %c11] : memref<8x21xf32, #tpu.memory_space<smem>>
      %143 = vector.broadcast %142 : f32 to vector<8x256xf32>
      %144 = arith.addf %141, %143 : vector<8x256xf32>
      %cst_70 = arith.constant 0.000000e+00 : f32
      %145 = vector.broadcast %cst_70 : f32 to vector<8x256xf32>
      %146 = arith.maximumf %144, %145 : vector<8x256xf32>
      %c1_71 = arith.constant 1 : index
      %c3_72 = arith.constant 3 : index
      %147 = memref.load %arg5[%c1_71, %c3_72] : memref<8x21xf32, #tpu.memory_space<smem>>
      %148 = vector.broadcast %147 : f32 to vector<8x256xf32>
      %149 = arith.mulf %148, %26 : vector<8x256xf32>
      %c1_73 = arith.constant 1 : index
      %c4_74 = arith.constant 4 : index
      %150 = memref.load %arg5[%c1_73, %c4_74] : memref<8x21xf32, #tpu.memory_space<smem>>
      %151 = vector.broadcast %150 : f32 to vector<8x256xf32>
      %152 = arith.mulf %151, %38 : vector<8x256xf32>
      %153 = arith.addf %149, %152 : vector<8x256xf32>
      %c1_75 = arith.constant 1 : index
      %c5_76 = arith.constant 5 : index
      %154 = memref.load %arg5[%c1_75, %c5_76] : memref<8x21xf32, #tpu.memory_space<smem>>
      %155 = vector.broadcast %154 : f32 to vector<8x256xf32>
      %156 = arith.mulf %155, %50 : vector<8x256xf32>
      %157 = arith.addf %153, %156 : vector<8x256xf32>
      %c1_77 = arith.constant 1 : index
      %c6_78 = arith.constant 6 : index
      %158 = memref.load %arg5[%c1_77, %c6_78] : memref<8x21xf32, #tpu.memory_space<smem>>
      %159 = vector.broadcast %158 : f32 to vector<8x256xf32>
      %160 = arith.mulf %159, %62 : vector<8x256xf32>
      %161 = arith.addf %157, %160 : vector<8x256xf32>
      %c1_79 = arith.constant 1 : index
      %c7_80 = arith.constant 7 : index
      %162 = memref.load %arg5[%c1_79, %c7_80] : memref<8x21xf32, #tpu.memory_space<smem>>
      %163 = vector.broadcast %162 : f32 to vector<8x256xf32>
      %164 = arith.mulf %163, %74 : vector<8x256xf32>
      %165 = arith.addf %161, %164 : vector<8x256xf32>
      %c1_81 = arith.constant 1 : index
      %c8_82 = arith.constant 8 : index
      %166 = memref.load %arg5[%c1_81, %c8_82] : memref<8x21xf32, #tpu.memory_space<smem>>
      %167 = vector.broadcast %166 : f32 to vector<8x256xf32>
      %168 = arith.mulf %167, %86 : vector<8x256xf32>
      %169 = arith.addf %165, %168 : vector<8x256xf32>
      %c1_83 = arith.constant 1 : index
      %c9_84 = arith.constant 9 : index
      %170 = memref.load %arg5[%c1_83, %c9_84] : memref<8x21xf32, #tpu.memory_space<smem>>
      %171 = vector.broadcast %170 : f32 to vector<8x256xf32>
      %172 = arith.mulf %171, %98 : vector<8x256xf32>
      %173 = arith.addf %169, %172 : vector<8x256xf32>
      %c1_85 = arith.constant 1 : index
      %c10_86 = arith.constant 10 : index
      %174 = memref.load %arg5[%c1_85, %c10_86] : memref<8x21xf32, #tpu.memory_space<smem>>
      %175 = vector.broadcast %174 : f32 to vector<8x256xf32>
      %176 = arith.mulf %175, %110 : vector<8x256xf32>
      %177 = arith.addf %173, %176 : vector<8x256xf32>
      %c1_87 = arith.constant 1 : index
      %c11_88 = arith.constant 11 : index
      %178 = memref.load %arg5[%c1_87, %c11_88] : memref<8x21xf32, #tpu.memory_space<smem>>
      %179 = vector.broadcast %178 : f32 to vector<8x256xf32>
      %180 = arith.addf %177, %179 : vector<8x256xf32>
      %cst_89 = arith.constant 0.000000e+00 : f32
      %181 = vector.broadcast %cst_89 : f32 to vector<8x256xf32>
      %182 = arith.maximumf %180, %181 : vector<8x256xf32>
      %c2_90 = arith.constant 2 : index
      %c3_91 = arith.constant 3 : index
      %183 = memref.load %arg5[%c2_90, %c3_91] : memref<8x21xf32, #tpu.memory_space<smem>>
      %184 = vector.broadcast %183 : f32 to vector<8x256xf32>
      %185 = arith.mulf %184, %26 : vector<8x256xf32>
      %c2_92 = arith.constant 2 : index
      %c4_93 = arith.constant 4 : index
      %186 = memref.load %arg5[%c2_92, %c4_93] : memref<8x21xf32, #tpu.memory_space<smem>>
      %187 = vector.broadcast %186 : f32 to vector<8x256xf32>
      %188 = arith.mulf %187, %38 : vector<8x256xf32>
      %189 = arith.addf %185, %188 : vector<8x256xf32>
      %c2_94 = arith.constant 2 : index
      %c5_95 = arith.constant 5 : index
      %190 = memref.load %arg5[%c2_94, %c5_95] : memref<8x21xf32, #tpu.memory_space<smem>>
      %191 = vector.broadcast %190 : f32 to vector<8x256xf32>
      %192 = arith.mulf %191, %50 : vector<8x256xf32>
      %193 = arith.addf %189, %192 : vector<8x256xf32>
      %c2_96 = arith.constant 2 : index
      %c6_97 = arith.constant 6 : index
      %194 = memref.load %arg5[%c2_96, %c6_97] : memref<8x21xf32, #tpu.memory_space<smem>>
      %195 = vector.broadcast %194 : f32 to vector<8x256xf32>
      %196 = arith.mulf %195, %62 : vector<8x256xf32>
      %197 = arith.addf %193, %196 : vector<8x256xf32>
      %c2_98 = arith.constant 2 : index
      %c7_99 = arith.constant 7 : index
      %198 = memref.load %arg5[%c2_98, %c7_99] : memref<8x21xf32, #tpu.memory_space<smem>>
      %199 = vector.broadcast %198 : f32 to vector<8x256xf32>
      %200 = arith.mulf %199, %74 : vector<8x256xf32>
      %201 = arith.addf %197, %200 : vector<8x256xf32>
      %c2_100 = arith.constant 2 : index
      %c8_101 = arith.constant 8 : index
      %202 = memref.load %arg5[%c2_100, %c8_101] : memref<8x21xf32, #tpu.memory_space<smem>>
      %203 = vector.broadcast %202 : f32 to vector<8x256xf32>
      %204 = arith.mulf %203, %86 : vector<8x256xf32>
      %205 = arith.addf %201, %204 : vector<8x256xf32>
      %c2_102 = arith.constant 2 : index
      %c9_103 = arith.constant 9 : index
      %206 = memref.load %arg5[%c2_102, %c9_103] : memref<8x21xf32, #tpu.memory_space<smem>>
      %207 = vector.broadcast %206 : f32 to vector<8x256xf32>
      %208 = arith.mulf %207, %98 : vector<8x256xf32>
      %209 = arith.addf %205, %208 : vector<8x256xf32>
      %c2_104 = arith.constant 2 : index
      %c10_105 = arith.constant 10 : index
      %210 = memref.load %arg5[%c2_104, %c10_105] : memref<8x21xf32, #tpu.memory_space<smem>>
      %211 = vector.broadcast %210 : f32 to vector<8x256xf32>
      %212 = arith.mulf %211, %110 : vector<8x256xf32>
      %213 = arith.addf %209, %212 : vector<8x256xf32>
      %c2_106 = arith.constant 2 : index
      %c11_107 = arith.constant 11 : index
      %214 = memref.load %arg5[%c2_106, %c11_107] : memref<8x21xf32, #tpu.memory_space<smem>>
      %215 = vector.broadcast %214 : f32 to vector<8x256xf32>
      %216 = arith.addf %213, %215 : vector<8x256xf32>
      %cst_108 = arith.constant 0.000000e+00 : f32
      %217 = vector.broadcast %cst_108 : f32 to vector<8x256xf32>
      %218 = arith.maximumf %216, %217 : vector<8x256xf32>
      %c3_109 = arith.constant 3 : index
      %c3_110 = arith.constant 3 : index
      %219 = memref.load %arg5[%c3_109, %c3_110] : memref<8x21xf32, #tpu.memory_space<smem>>
      %220 = vector.broadcast %219 : f32 to vector<8x256xf32>
      %221 = arith.mulf %220, %26 : vector<8x256xf32>
      %c3_111 = arith.constant 3 : index
      %c4_112 = arith.constant 4 : index
      %222 = memref.load %arg5[%c3_111, %c4_112] : memref<8x21xf32, #tpu.memory_space<smem>>
      %223 = vector.broadcast %222 : f32 to vector<8x256xf32>
      %224 = arith.mulf %223, %38 : vector<8x256xf32>
      %225 = arith.addf %221, %224 : vector<8x256xf32>
      %c3_113 = arith.constant 3 : index
      %c5_114 = arith.constant 5 : index
      %226 = memref.load %arg5[%c3_113, %c5_114] : memref<8x21xf32, #tpu.memory_space<smem>>
      %227 = vector.broadcast %226 : f32 to vector<8x256xf32>
      %228 = arith.mulf %227, %50 : vector<8x256xf32>
      %229 = arith.addf %225, %228 : vector<8x256xf32>
      %c3_115 = arith.constant 3 : index
      %c6_116 = arith.constant 6 : index
      %230 = memref.load %arg5[%c3_115, %c6_116] : memref<8x21xf32, #tpu.memory_space<smem>>
      %231 = vector.broadcast %230 : f32 to vector<8x256xf32>
      %232 = arith.mulf %231, %62 : vector<8x256xf32>
      %233 = arith.addf %229, %232 : vector<8x256xf32>
      %c3_117 = arith.constant 3 : index
      %c7_118 = arith.constant 7 : index
      %234 = memref.load %arg5[%c3_117, %c7_118] : memref<8x21xf32, #tpu.memory_space<smem>>
      %235 = vector.broadcast %234 : f32 to vector<8x256xf32>
      %236 = arith.mulf %235, %74 : vector<8x256xf32>
      %237 = arith.addf %233, %236 : vector<8x256xf32>
      %c3_119 = arith.constant 3 : index
      %c8_120 = arith.constant 8 : index
      %238 = memref.load %arg5[%c3_119, %c8_120] : memref<8x21xf32, #tpu.memory_space<smem>>
      %239 = vector.broadcast %238 : f32 to vector<8x256xf32>
      %240 = arith.mulf %239, %86 : vector<8x256xf32>
      %241 = arith.addf %237, %240 : vector<8x256xf32>
      %c3_121 = arith.constant 3 : index
      %c9_122 = arith.constant 9 : index
      %242 = memref.load %arg5[%c3_121, %c9_122] : memref<8x21xf32, #tpu.memory_space<smem>>
      %243 = vector.broadcast %242 : f32 to vector<8x256xf32>
      %244 = arith.mulf %243, %98 : vector<8x256xf32>
      %245 = arith.addf %241, %244 : vector<8x256xf32>
      %c3_123 = arith.constant 3 : index
      %c10_124 = arith.constant 10 : index
      %246 = memref.load %arg5[%c3_123, %c10_124] : memref<8x21xf32, #tpu.memory_space<smem>>
      %247 = vector.broadcast %246 : f32 to vector<8x256xf32>
      %248 = arith.mulf %247, %110 : vector<8x256xf32>
      %249 = arith.addf %245, %248 : vector<8x256xf32>
      %c3_125 = arith.constant 3 : index
      %c11_126 = arith.constant 11 : index
      %250 = memref.load %arg5[%c3_125, %c11_126] : memref<8x21xf32, #tpu.memory_space<smem>>
      %251 = vector.broadcast %250 : f32 to vector<8x256xf32>
      %252 = arith.addf %249, %251 : vector<8x256xf32>
      %cst_127 = arith.constant 0.000000e+00 : f32
      %253 = vector.broadcast %cst_127 : f32 to vector<8x256xf32>
      %254 = arith.maximumf %252, %253 : vector<8x256xf32>
      %c4_128 = arith.constant 4 : index
      %c3_129 = arith.constant 3 : index
      %255 = memref.load %arg5[%c4_128, %c3_129] : memref<8x21xf32, #tpu.memory_space<smem>>
      %256 = vector.broadcast %255 : f32 to vector<8x256xf32>
      %257 = arith.mulf %256, %26 : vector<8x256xf32>
      %c4_130 = arith.constant 4 : index
      %c4_131 = arith.constant 4 : index
      %258 = memref.load %arg5[%c4_130, %c4_131] : memref<8x21xf32, #tpu.memory_space<smem>>
      %259 = vector.broadcast %258 : f32 to vector<8x256xf32>
      %260 = arith.mulf %259, %38 : vector<8x256xf32>
      %261 = arith.addf %257, %260 : vector<8x256xf32>
      %c4_132 = arith.constant 4 : index
      %c5_133 = arith.constant 5 : index
      %262 = memref.load %arg5[%c4_132, %c5_133] : memref<8x21xf32, #tpu.memory_space<smem>>
      %263 = vector.broadcast %262 : f32 to vector<8x256xf32>
      %264 = arith.mulf %263, %50 : vector<8x256xf32>
      %265 = arith.addf %261, %264 : vector<8x256xf32>
      %c4_134 = arith.constant 4 : index
      %c6_135 = arith.constant 6 : index
      %266 = memref.load %arg5[%c4_134, %c6_135] : memref<8x21xf32, #tpu.memory_space<smem>>
      %267 = vector.broadcast %266 : f32 to vector<8x256xf32>
      %268 = arith.mulf %267, %62 : vector<8x256xf32>
      %269 = arith.addf %265, %268 : vector<8x256xf32>
      %c4_136 = arith.constant 4 : index
      %c7_137 = arith.constant 7 : index
      %270 = memref.load %arg5[%c4_136, %c7_137] : memref<8x21xf32, #tpu.memory_space<smem>>
      %271 = vector.broadcast %270 : f32 to vector<8x256xf32>
      %272 = arith.mulf %271, %74 : vector<8x256xf32>
      %273 = arith.addf %269, %272 : vector<8x256xf32>
      %c4_138 = arith.constant 4 : index
      %c8_139 = arith.constant 8 : index
      %274 = memref.load %arg5[%c4_138, %c8_139] : memref<8x21xf32, #tpu.memory_space<smem>>
      %275 = vector.broadcast %274 : f32 to vector<8x256xf32>
      %276 = arith.mulf %275, %86 : vector<8x256xf32>
      %277 = arith.addf %273, %276 : vector<8x256xf32>
      %c4_140 = arith.constant 4 : index
      %c9_141 = arith.constant 9 : index
      %278 = memref.load %arg5[%c4_140, %c9_141] : memref<8x21xf32, #tpu.memory_space<smem>>
      %279 = vector.broadcast %278 : f32 to vector<8x256xf32>
      %280 = arith.mulf %279, %98 : vector<8x256xf32>
      %281 = arith.addf %277, %280 : vector<8x256xf32>
      %c4_142 = arith.constant 4 : index
      %c10_143 = arith.constant 10 : index
      %282 = memref.load %arg5[%c4_142, %c10_143] : memref<8x21xf32, #tpu.memory_space<smem>>
      %283 = vector.broadcast %282 : f32 to vector<8x256xf32>
      %284 = arith.mulf %283, %110 : vector<8x256xf32>
      %285 = arith.addf %281, %284 : vector<8x256xf32>
      %c4_144 = arith.constant 4 : index
      %c11_145 = arith.constant 11 : index
      %286 = memref.load %arg5[%c4_144, %c11_145] : memref<8x21xf32, #tpu.memory_space<smem>>
      %287 = vector.broadcast %286 : f32 to vector<8x256xf32>
      %288 = arith.addf %285, %287 : vector<8x256xf32>
      %cst_146 = arith.constant 0.000000e+00 : f32
      %289 = vector.broadcast %cst_146 : f32 to vector<8x256xf32>
      %290 = arith.maximumf %288, %289 : vector<8x256xf32>
      %c5_147 = arith.constant 5 : index
      %c3_148 = arith.constant 3 : index
      %291 = memref.load %arg5[%c5_147, %c3_148] : memref<8x21xf32, #tpu.memory_space<smem>>
      %292 = vector.broadcast %291 : f32 to vector<8x256xf32>
      %293 = arith.mulf %292, %26 : vector<8x256xf32>
      %c5_149 = arith.constant 5 : index
      %c4_150 = arith.constant 4 : index
      %294 = memref.load %arg5[%c5_149, %c4_150] : memref<8x21xf32, #tpu.memory_space<smem>>
      %295 = vector.broadcast %294 : f32 to vector<8x256xf32>
      %296 = arith.mulf %295, %38 : vector<8x256xf32>
      %297 = arith.addf %293, %296 : vector<8x256xf32>
      %c5_151 = arith.constant 5 : index
      %c5_152 = arith.constant 5 : index
      %298 = memref.load %arg5[%c5_151, %c5_152] : memref<8x21xf32, #tpu.memory_space<smem>>
      %299 = vector.broadcast %298 : f32 to vector<8x256xf32>
      %300 = arith.mulf %299, %50 : vector<8x256xf32>
      %301 = arith.addf %297, %300 : vector<8x256xf32>
      %c5_153 = arith.constant 5 : index
      %c6_154 = arith.constant 6 : index
      %302 = memref.load %arg5[%c5_153, %c6_154] : memref<8x21xf32, #tpu.memory_space<smem>>
      %303 = vector.broadcast %302 : f32 to vector<8x256xf32>
      %304 = arith.mulf %303, %62 : vector<8x256xf32>
      %305 = arith.addf %301, %304 : vector<8x256xf32>
      %c5_155 = arith.constant 5 : index
      %c7_156 = arith.constant 7 : index
      %306 = memref.load %arg5[%c5_155, %c7_156] : memref<8x21xf32, #tpu.memory_space<smem>>
      %307 = vector.broadcast %306 : f32 to vector<8x256xf32>
      %308 = arith.mulf %307, %74 : vector<8x256xf32>
      %309 = arith.addf %305, %308 : vector<8x256xf32>
      %c5_157 = arith.constant 5 : index
      %c8_158 = arith.constant 8 : index
      %310 = memref.load %arg5[%c5_157, %c8_158] : memref<8x21xf32, #tpu.memory_space<smem>>
      %311 = vector.broadcast %310 : f32 to vector<8x256xf32>
      %312 = arith.mulf %311, %86 : vector<8x256xf32>
      %313 = arith.addf %309, %312 : vector<8x256xf32>
      %c5_159 = arith.constant 5 : index
      %c9_160 = arith.constant 9 : index
      %314 = memref.load %arg5[%c5_159, %c9_160] : memref<8x21xf32, #tpu.memory_space<smem>>
      %315 = vector.broadcast %314 : f32 to vector<8x256xf32>
      %316 = arith.mulf %315, %98 : vector<8x256xf32>
      %317 = arith.addf %313, %316 : vector<8x256xf32>
      %c5_161 = arith.constant 5 : index
      %c10_162 = arith.constant 10 : index
      %318 = memref.load %arg5[%c5_161, %c10_162] : memref<8x21xf32, #tpu.memory_space<smem>>
      %319 = vector.broadcast %318 : f32 to vector<8x256xf32>
      %320 = arith.mulf %319, %110 : vector<8x256xf32>
      %321 = arith.addf %317, %320 : vector<8x256xf32>
      %c5_163 = arith.constant 5 : index
      %c11_164 = arith.constant 11 : index
      %322 = memref.load %arg5[%c5_163, %c11_164] : memref<8x21xf32, #tpu.memory_space<smem>>
      %323 = vector.broadcast %322 : f32 to vector<8x256xf32>
      %324 = arith.addf %321, %323 : vector<8x256xf32>
      %cst_165 = arith.constant 0.000000e+00 : f32
      %325 = vector.broadcast %cst_165 : f32 to vector<8x256xf32>
      %326 = arith.maximumf %324, %325 : vector<8x256xf32>
      %c6_166 = arith.constant 6 : index
      %c3_167 = arith.constant 3 : index
      %327 = memref.load %arg5[%c6_166, %c3_167] : memref<8x21xf32, #tpu.memory_space<smem>>
      %328 = vector.broadcast %327 : f32 to vector<8x256xf32>
      %329 = arith.mulf %328, %26 : vector<8x256xf32>
      %c6_168 = arith.constant 6 : index
      %c4_169 = arith.constant 4 : index
      %330 = memref.load %arg5[%c6_168, %c4_169] : memref<8x21xf32, #tpu.memory_space<smem>>
      %331 = vector.broadcast %330 : f32 to vector<8x256xf32>
      %332 = arith.mulf %331, %38 : vector<8x256xf32>
      %333 = arith.addf %329, %332 : vector<8x256xf32>
      %c6_170 = arith.constant 6 : index
      %c5_171 = arith.constant 5 : index
      %334 = memref.load %arg5[%c6_170, %c5_171] : memref<8x21xf32, #tpu.memory_space<smem>>
      %335 = vector.broadcast %334 : f32 to vector<8x256xf32>
      %336 = arith.mulf %335, %50 : vector<8x256xf32>
      %337 = arith.addf %333, %336 : vector<8x256xf32>
      %c6_172 = arith.constant 6 : index
      %c6_173 = arith.constant 6 : index
      %338 = memref.load %arg5[%c6_172, %c6_173] : memref<8x21xf32, #tpu.memory_space<smem>>
      %339 = vector.broadcast %338 : f32 to vector<8x256xf32>
      %340 = arith.mulf %339, %62 : vector<8x256xf32>
      %341 = arith.addf %337, %340 : vector<8x256xf32>
      %c6_174 = arith.constant 6 : index
      %c7_175 = arith.constant 7 : index
      %342 = memref.load %arg5[%c6_174, %c7_175] : memref<8x21xf32, #tpu.memory_space<smem>>
      %343 = vector.broadcast %342 : f32 to vector<8x256xf32>
      %344 = arith.mulf %343, %74 : vector<8x256xf32>
      %345 = arith.addf %341, %344 : vector<8x256xf32>
      %c6_176 = arith.constant 6 : index
      %c8_177 = arith.constant 8 : index
      %346 = memref.load %arg5[%c6_176, %c8_177] : memref<8x21xf32, #tpu.memory_space<smem>>
      %347 = vector.broadcast %346 : f32 to vector<8x256xf32>
      %348 = arith.mulf %347, %86 : vector<8x256xf32>
      %349 = arith.addf %345, %348 : vector<8x256xf32>
      %c6_178 = arith.constant 6 : index
      %c9_179 = arith.constant 9 : index
      %350 = memref.load %arg5[%c6_178, %c9_179] : memref<8x21xf32, #tpu.memory_space<smem>>
      %351 = vector.broadcast %350 : f32 to vector<8x256xf32>
      %352 = arith.mulf %351, %98 : vector<8x256xf32>
      %353 = arith.addf %349, %352 : vector<8x256xf32>
      %c6_180 = arith.constant 6 : index
      %c10_181 = arith.constant 10 : index
      %354 = memref.load %arg5[%c6_180, %c10_181] : memref<8x21xf32, #tpu.memory_space<smem>>
      %355 = vector.broadcast %354 : f32 to vector<8x256xf32>
      %356 = arith.mulf %355, %110 : vector<8x256xf32>
      %357 = arith.addf %353, %356 : vector<8x256xf32>
      %c6_182 = arith.constant 6 : index
      %c11_183 = arith.constant 11 : index
      %358 = memref.load %arg5[%c6_182, %c11_183] : memref<8x21xf32, #tpu.memory_space<smem>>
      %359 = vector.broadcast %358 : f32 to vector<8x256xf32>
      %360 = arith.addf %357, %359 : vector<8x256xf32>
      %cst_184 = arith.constant 0.000000e+00 : f32
      %361 = vector.broadcast %cst_184 : f32 to vector<8x256xf32>
      %362 = arith.maximumf %360, %361 : vector<8x256xf32>
      %c7_185 = arith.constant 7 : index
      %c3_186 = arith.constant 3 : index
      %363 = memref.load %arg5[%c7_185, %c3_186] : memref<8x21xf32, #tpu.memory_space<smem>>
      %364 = vector.broadcast %363 : f32 to vector<8x256xf32>
      %365 = arith.mulf %364, %26 : vector<8x256xf32>
      %c7_187 = arith.constant 7 : index
      %c4_188 = arith.constant 4 : index
      %366 = memref.load %arg5[%c7_187, %c4_188] : memref<8x21xf32, #tpu.memory_space<smem>>
      %367 = vector.broadcast %366 : f32 to vector<8x256xf32>
      %368 = arith.mulf %367, %38 : vector<8x256xf32>
      %369 = arith.addf %365, %368 : vector<8x256xf32>
      %c7_189 = arith.constant 7 : index
      %c5_190 = arith.constant 5 : index
      %370 = memref.load %arg5[%c7_189, %c5_190] : memref<8x21xf32, #tpu.memory_space<smem>>
      %371 = vector.broadcast %370 : f32 to vector<8x256xf32>
      %372 = arith.mulf %371, %50 : vector<8x256xf32>
      %373 = arith.addf %369, %372 : vector<8x256xf32>
      %c7_191 = arith.constant 7 : index
      %c6_192 = arith.constant 6 : index
      %374 = memref.load %arg5[%c7_191, %c6_192] : memref<8x21xf32, #tpu.memory_space<smem>>
      %375 = vector.broadcast %374 : f32 to vector<8x256xf32>
      %376 = arith.mulf %375, %62 : vector<8x256xf32>
      %377 = arith.addf %373, %376 : vector<8x256xf32>
      %c7_193 = arith.constant 7 : index
      %c7_194 = arith.constant 7 : index
      %378 = memref.load %arg5[%c7_193, %c7_194] : memref<8x21xf32, #tpu.memory_space<smem>>
      %379 = vector.broadcast %378 : f32 to vector<8x256xf32>
      %380 = arith.mulf %379, %74 : vector<8x256xf32>
      %381 = arith.addf %377, %380 : vector<8x256xf32>
      %c7_195 = arith.constant 7 : index
      %c8_196 = arith.constant 8 : index
      %382 = memref.load %arg5[%c7_195, %c8_196] : memref<8x21xf32, #tpu.memory_space<smem>>
      %383 = vector.broadcast %382 : f32 to vector<8x256xf32>
      %384 = arith.mulf %383, %86 : vector<8x256xf32>
      %385 = arith.addf %381, %384 : vector<8x256xf32>
      %c7_197 = arith.constant 7 : index
      %c9_198 = arith.constant 9 : index
      %386 = memref.load %arg5[%c7_197, %c9_198] : memref<8x21xf32, #tpu.memory_space<smem>>
      %387 = vector.broadcast %386 : f32 to vector<8x256xf32>
      %388 = arith.mulf %387, %98 : vector<8x256xf32>
      %389 = arith.addf %385, %388 : vector<8x256xf32>
      %c7_199 = arith.constant 7 : index
      %c10_200 = arith.constant 10 : index
      %390 = memref.load %arg5[%c7_199, %c10_200] : memref<8x21xf32, #tpu.memory_space<smem>>
      %391 = vector.broadcast %390 : f32 to vector<8x256xf32>
      %392 = arith.mulf %391, %110 : vector<8x256xf32>
      %393 = arith.addf %389, %392 : vector<8x256xf32>
      %c7_201 = arith.constant 7 : index
      %c11_202 = arith.constant 11 : index
      %394 = memref.load %arg5[%c7_201, %c11_202] : memref<8x21xf32, #tpu.memory_space<smem>>
      %395 = vector.broadcast %394 : f32 to vector<8x256xf32>
      %396 = arith.addf %393, %395 : vector<8x256xf32>
      %cst_203 = arith.constant 0.000000e+00 : f32
      %397 = vector.broadcast %cst_203 : f32 to vector<8x256xf32>
      %398 = arith.maximumf %396, %397 : vector<8x256xf32>
      %c0_204 = arith.constant 0 : index
      %c12 = arith.constant 12 : index
      %399 = memref.load %arg5[%c0_204, %c12] : memref<8x21xf32, #tpu.memory_space<smem>>
      %400 = vector.broadcast %399 : f32 to vector<8x256xf32>
      %401 = arith.mulf %400, %146 : vector<8x256xf32>
      %c0_205 = arith.constant 0 : index
      %c13 = arith.constant 13 : index
      %402 = memref.load %arg5[%c0_205, %c13] : memref<8x21xf32, #tpu.memory_space<smem>>
      %403 = vector.broadcast %402 : f32 to vector<8x256xf32>
      %404 = arith.mulf %403, %182 : vector<8x256xf32>
      %405 = arith.addf %401, %404 : vector<8x256xf32>
      %c0_206 = arith.constant 0 : index
      %c14 = arith.constant 14 : index
      %406 = memref.load %arg5[%c0_206, %c14] : memref<8x21xf32, #tpu.memory_space<smem>>
      %407 = vector.broadcast %406 : f32 to vector<8x256xf32>
      %408 = arith.mulf %407, %218 : vector<8x256xf32>
      %409 = arith.addf %405, %408 : vector<8x256xf32>
      %c0_207 = arith.constant 0 : index
      %c15 = arith.constant 15 : index
      %410 = memref.load %arg5[%c0_207, %c15] : memref<8x21xf32, #tpu.memory_space<smem>>
      %411 = vector.broadcast %410 : f32 to vector<8x256xf32>
      %412 = arith.mulf %411, %254 : vector<8x256xf32>
      %413 = arith.addf %409, %412 : vector<8x256xf32>
      %c0_208 = arith.constant 0 : index
      %c16 = arith.constant 16 : index
      %414 = memref.load %arg5[%c0_208, %c16] : memref<8x21xf32, #tpu.memory_space<smem>>
      %415 = vector.broadcast %414 : f32 to vector<8x256xf32>
      %416 = arith.mulf %415, %290 : vector<8x256xf32>
      %417 = arith.addf %413, %416 : vector<8x256xf32>
      %c0_209 = arith.constant 0 : index
      %c17 = arith.constant 17 : index
      %418 = memref.load %arg5[%c0_209, %c17] : memref<8x21xf32, #tpu.memory_space<smem>>
      %419 = vector.broadcast %418 : f32 to vector<8x256xf32>
      %420 = arith.mulf %419, %326 : vector<8x256xf32>
      %421 = arith.addf %417, %420 : vector<8x256xf32>
      %c0_210 = arith.constant 0 : index
      %c18 = arith.constant 18 : index
      %422 = memref.load %arg5[%c0_210, %c18] : memref<8x21xf32, #tpu.memory_space<smem>>
      %423 = vector.broadcast %422 : f32 to vector<8x256xf32>
      %424 = arith.mulf %423, %362 : vector<8x256xf32>
      %425 = arith.addf %421, %424 : vector<8x256xf32>
      %c0_211 = arith.constant 0 : index
      %c19 = arith.constant 19 : index
      %426 = memref.load %arg5[%c0_211, %c19] : memref<8x21xf32, #tpu.memory_space<smem>>
      %427 = vector.broadcast %426 : f32 to vector<8x256xf32>
      %428 = arith.mulf %427, %398 : vector<8x256xf32>
      %429 = arith.addf %425, %428 : vector<8x256xf32>
      %c0_212 = arith.constant 0 : index
      %c20 = arith.constant 20 : index
      %430 = memref.load %arg5[%c0_212, %c20] : memref<8x21xf32, #tpu.memory_space<smem>>
      %431 = vector.broadcast %430 : f32 to vector<8x256xf32>
      %432 = arith.addf %429, %431 : vector<8x256xf32>
      %c1_213 = arith.constant 1 : index
      %c12_214 = arith.constant 12 : index
      %433 = memref.load %arg5[%c1_213, %c12_214] : memref<8x21xf32, #tpu.memory_space<smem>>
      %434 = vector.broadcast %433 : f32 to vector<8x256xf32>
      %435 = arith.mulf %434, %146 : vector<8x256xf32>
      %c1_215 = arith.constant 1 : index
      %c13_216 = arith.constant 13 : index
      %436 = memref.load %arg5[%c1_215, %c13_216] : memref<8x21xf32, #tpu.memory_space<smem>>
      %437 = vector.broadcast %436 : f32 to vector<8x256xf32>
      %438 = arith.mulf %437, %182 : vector<8x256xf32>
      %439 = arith.addf %435, %438 : vector<8x256xf32>
      %c1_217 = arith.constant 1 : index
      %c14_218 = arith.constant 14 : index
      %440 = memref.load %arg5[%c1_217, %c14_218] : memref<8x21xf32, #tpu.memory_space<smem>>
      %441 = vector.broadcast %440 : f32 to vector<8x256xf32>
      %442 = arith.mulf %441, %218 : vector<8x256xf32>
      %443 = arith.addf %439, %442 : vector<8x256xf32>
      %c1_219 = arith.constant 1 : index
      %c15_220 = arith.constant 15 : index
      %444 = memref.load %arg5[%c1_219, %c15_220] : memref<8x21xf32, #tpu.memory_space<smem>>
      %445 = vector.broadcast %444 : f32 to vector<8x256xf32>
      %446 = arith.mulf %445, %254 : vector<8x256xf32>
      %447 = arith.addf %443, %446 : vector<8x256xf32>
      %c1_221 = arith.constant 1 : index
      %c16_222 = arith.constant 16 : index
      %448 = memref.load %arg5[%c1_221, %c16_222] : memref<8x21xf32, #tpu.memory_space<smem>>
      %449 = vector.broadcast %448 : f32 to vector<8x256xf32>
      %450 = arith.mulf %449, %290 : vector<8x256xf32>
      %451 = arith.addf %447, %450 : vector<8x256xf32>
      %c1_223 = arith.constant 1 : index
      %c17_224 = arith.constant 17 : index
      %452 = memref.load %arg5[%c1_223, %c17_224] : memref<8x21xf32, #tpu.memory_space<smem>>
      %453 = vector.broadcast %452 : f32 to vector<8x256xf32>
      %454 = arith.mulf %453, %326 : vector<8x256xf32>
      %455 = arith.addf %451, %454 : vector<8x256xf32>
      %c1_225 = arith.constant 1 : index
      %c18_226 = arith.constant 18 : index
      %456 = memref.load %arg5[%c1_225, %c18_226] : memref<8x21xf32, #tpu.memory_space<smem>>
      %457 = vector.broadcast %456 : f32 to vector<8x256xf32>
      %458 = arith.mulf %457, %362 : vector<8x256xf32>
      %459 = arith.addf %455, %458 : vector<8x256xf32>
      %c1_227 = arith.constant 1 : index
      %c19_228 = arith.constant 19 : index
      %460 = memref.load %arg5[%c1_227, %c19_228] : memref<8x21xf32, #tpu.memory_space<smem>>
      %461 = vector.broadcast %460 : f32 to vector<8x256xf32>
      %462 = arith.mulf %461, %398 : vector<8x256xf32>
      %463 = arith.addf %459, %462 : vector<8x256xf32>
      %c1_229 = arith.constant 1 : index
      %c20_230 = arith.constant 20 : index
      %464 = memref.load %arg5[%c1_229, %c20_230] : memref<8x21xf32, #tpu.memory_space<smem>>
      %465 = vector.broadcast %464 : f32 to vector<8x256xf32>
      %466 = arith.addf %463, %465 : vector<8x256xf32>
      %c2_231 = arith.constant 2 : index
      %c12_232 = arith.constant 12 : index
      %467 = memref.load %arg5[%c2_231, %c12_232] : memref<8x21xf32, #tpu.memory_space<smem>>
      %468 = vector.broadcast %467 : f32 to vector<8x256xf32>
      %469 = arith.mulf %468, %146 : vector<8x256xf32>
      %c2_233 = arith.constant 2 : index
      %c13_234 = arith.constant 13 : index
      %470 = memref.load %arg5[%c2_233, %c13_234] : memref<8x21xf32, #tpu.memory_space<smem>>
      %471 = vector.broadcast %470 : f32 to vector<8x256xf32>
      %472 = arith.mulf %471, %182 : vector<8x256xf32>
      %473 = arith.addf %469, %472 : vector<8x256xf32>
      %c2_235 = arith.constant 2 : index
      %c14_236 = arith.constant 14 : index
      %474 = memref.load %arg5[%c2_235, %c14_236] : memref<8x21xf32, #tpu.memory_space<smem>>
      %475 = vector.broadcast %474 : f32 to vector<8x256xf32>
      %476 = arith.mulf %475, %218 : vector<8x256xf32>
      %477 = arith.addf %473, %476 : vector<8x256xf32>
      %c2_237 = arith.constant 2 : index
      %c15_238 = arith.constant 15 : index
      %478 = memref.load %arg5[%c2_237, %c15_238] : memref<8x21xf32, #tpu.memory_space<smem>>
      %479 = vector.broadcast %478 : f32 to vector<8x256xf32>
      %480 = arith.mulf %479, %254 : vector<8x256xf32>
      %481 = arith.addf %477, %480 : vector<8x256xf32>
      %c2_239 = arith.constant 2 : index
      %c16_240 = arith.constant 16 : index
      %482 = memref.load %arg5[%c2_239, %c16_240] : memref<8x21xf32, #tpu.memory_space<smem>>
      %483 = vector.broadcast %482 : f32 to vector<8x256xf32>
      %484 = arith.mulf %483, %290 : vector<8x256xf32>
      %485 = arith.addf %481, %484 : vector<8x256xf32>
      %c2_241 = arith.constant 2 : index
      %c17_242 = arith.constant 17 : index
      %486 = memref.load %arg5[%c2_241, %c17_242] : memref<8x21xf32, #tpu.memory_space<smem>>
      %487 = vector.broadcast %486 : f32 to vector<8x256xf32>
      %488 = arith.mulf %487, %326 : vector<8x256xf32>
      %489 = arith.addf %485, %488 : vector<8x256xf32>
      %c2_243 = arith.constant 2 : index
      %c18_244 = arith.constant 18 : index
      %490 = memref.load %arg5[%c2_243, %c18_244] : memref<8x21xf32, #tpu.memory_space<smem>>
      %491 = vector.broadcast %490 : f32 to vector<8x256xf32>
      %492 = arith.mulf %491, %362 : vector<8x256xf32>
      %493 = arith.addf %489, %492 : vector<8x256xf32>
      %c2_245 = arith.constant 2 : index
      %c19_246 = arith.constant 19 : index
      %494 = memref.load %arg5[%c2_245, %c19_246] : memref<8x21xf32, #tpu.memory_space<smem>>
      %495 = vector.broadcast %494 : f32 to vector<8x256xf32>
      %496 = arith.mulf %495, %398 : vector<8x256xf32>
      %497 = arith.addf %493, %496 : vector<8x256xf32>
      %c2_247 = arith.constant 2 : index
      %c20_248 = arith.constant 20 : index
      %498 = memref.load %arg5[%c2_247, %c20_248] : memref<8x21xf32, #tpu.memory_space<smem>>
      %499 = vector.broadcast %498 : f32 to vector<8x256xf32>
      %500 = arith.addf %497, %499 : vector<8x256xf32>
      %c3_249 = arith.constant 3 : index
      %c12_250 = arith.constant 12 : index
      %501 = memref.load %arg5[%c3_249, %c12_250] : memref<8x21xf32, #tpu.memory_space<smem>>
      %502 = vector.broadcast %501 : f32 to vector<8x256xf32>
      %503 = arith.mulf %502, %146 : vector<8x256xf32>
      %c3_251 = arith.constant 3 : index
      %c13_252 = arith.constant 13 : index
      %504 = memref.load %arg5[%c3_251, %c13_252] : memref<8x21xf32, #tpu.memory_space<smem>>
      %505 = vector.broadcast %504 : f32 to vector<8x256xf32>
      %506 = arith.mulf %505, %182 : vector<8x256xf32>
      %507 = arith.addf %503, %506 : vector<8x256xf32>
      %c3_253 = arith.constant 3 : index
      %c14_254 = arith.constant 14 : index
      %508 = memref.load %arg5[%c3_253, %c14_254] : memref<8x21xf32, #tpu.memory_space<smem>>
      %509 = vector.broadcast %508 : f32 to vector<8x256xf32>
      %510 = arith.mulf %509, %218 : vector<8x256xf32>
      %511 = arith.addf %507, %510 : vector<8x256xf32>
      %c3_255 = arith.constant 3 : index
      %c15_256 = arith.constant 15 : index
      %512 = memref.load %arg5[%c3_255, %c15_256] : memref<8x21xf32, #tpu.memory_space<smem>>
      %513 = vector.broadcast %512 : f32 to vector<8x256xf32>
      %514 = arith.mulf %513, %254 : vector<8x256xf32>
      %515 = arith.addf %511, %514 : vector<8x256xf32>
      %c3_257 = arith.constant 3 : index
      %c16_258 = arith.constant 16 : index
      %516 = memref.load %arg5[%c3_257, %c16_258] : memref<8x21xf32, #tpu.memory_space<smem>>
      %517 = vector.broadcast %516 : f32 to vector<8x256xf32>
      %518 = arith.mulf %517, %290 : vector<8x256xf32>
      %519 = arith.addf %515, %518 : vector<8x256xf32>
      %c3_259 = arith.constant 3 : index
      %c17_260 = arith.constant 17 : index
      %520 = memref.load %arg5[%c3_259, %c17_260] : memref<8x21xf32, #tpu.memory_space<smem>>
      %521 = vector.broadcast %520 : f32 to vector<8x256xf32>
      %522 = arith.mulf %521, %326 : vector<8x256xf32>
      %523 = arith.addf %519, %522 : vector<8x256xf32>
      %c3_261 = arith.constant 3 : index
      %c18_262 = arith.constant 18 : index
      %524 = memref.load %arg5[%c3_261, %c18_262] : memref<8x21xf32, #tpu.memory_space<smem>>
      %525 = vector.broadcast %524 : f32 to vector<8x256xf32>
      %526 = arith.mulf %525, %362 : vector<8x256xf32>
      %527 = arith.addf %523, %526 : vector<8x256xf32>
      %c3_263 = arith.constant 3 : index
      %c19_264 = arith.constant 19 : index
      %528 = memref.load %arg5[%c3_263, %c19_264] : memref<8x21xf32, #tpu.memory_space<smem>>
      %529 = vector.broadcast %528 : f32 to vector<8x256xf32>
      %530 = arith.mulf %529, %398 : vector<8x256xf32>
      %531 = arith.addf %527, %530 : vector<8x256xf32>
      %c3_265 = arith.constant 3 : index
      %c20_266 = arith.constant 20 : index
      %532 = memref.load %arg5[%c3_265, %c20_266] : memref<8x21xf32, #tpu.memory_space<smem>>
      %533 = vector.broadcast %532 : f32 to vector<8x256xf32>
      %534 = arith.addf %531, %533 : vector<8x256xf32>
      %c4_267 = arith.constant 4 : index
      %c12_268 = arith.constant 12 : index
      %535 = memref.load %arg5[%c4_267, %c12_268] : memref<8x21xf32, #tpu.memory_space<smem>>
      %536 = vector.broadcast %535 : f32 to vector<8x256xf32>
      %537 = arith.mulf %536, %146 : vector<8x256xf32>
      %c4_269 = arith.constant 4 : index
      %c13_270 = arith.constant 13 : index
      %538 = memref.load %arg5[%c4_269, %c13_270] : memref<8x21xf32, #tpu.memory_space<smem>>
      %539 = vector.broadcast %538 : f32 to vector<8x256xf32>
      %540 = arith.mulf %539, %182 : vector<8x256xf32>
      %541 = arith.addf %537, %540 : vector<8x256xf32>
      %c4_271 = arith.constant 4 : index
      %c14_272 = arith.constant 14 : index
      %542 = memref.load %arg5[%c4_271, %c14_272] : memref<8x21xf32, #tpu.memory_space<smem>>
      %543 = vector.broadcast %542 : f32 to vector<8x256xf32>
      %544 = arith.mulf %543, %218 : vector<8x256xf32>
      %545 = arith.addf %541, %544 : vector<8x256xf32>
      %c4_273 = arith.constant 4 : index
      %c15_274 = arith.constant 15 : index
      %546 = memref.load %arg5[%c4_273, %c15_274] : memref<8x21xf32, #tpu.memory_space<smem>>
      %547 = vector.broadcast %546 : f32 to vector<8x256xf32>
      %548 = arith.mulf %547, %254 : vector<8x256xf32>
      %549 = arith.addf %545, %548 : vector<8x256xf32>
      %c4_275 = arith.constant 4 : index
      %c16_276 = arith.constant 16 : index
      %550 = memref.load %arg5[%c4_275, %c16_276] : memref<8x21xf32, #tpu.memory_space<smem>>
      %551 = vector.broadcast %550 : f32 to vector<8x256xf32>
      %552 = arith.mulf %551, %290 : vector<8x256xf32>
      %553 = arith.addf %549, %552 : vector<8x256xf32>
      %c4_277 = arith.constant 4 : index
      %c17_278 = arith.constant 17 : index
      %554 = memref.load %arg5[%c4_277, %c17_278] : memref<8x21xf32, #tpu.memory_space<smem>>
      %555 = vector.broadcast %554 : f32 to vector<8x256xf32>
      %556 = arith.mulf %555, %326 : vector<8x256xf32>
      %557 = arith.addf %553, %556 : vector<8x256xf32>
      %c4_279 = arith.constant 4 : index
      %c18_280 = arith.constant 18 : index
      %558 = memref.load %arg5[%c4_279, %c18_280] : memref<8x21xf32, #tpu.memory_space<smem>>
      %559 = vector.broadcast %558 : f32 to vector<8x256xf32>
      %560 = arith.mulf %559, %362 : vector<8x256xf32>
      %561 = arith.addf %557, %560 : vector<8x256xf32>
      %c4_281 = arith.constant 4 : index
      %c19_282 = arith.constant 19 : index
      %562 = memref.load %arg5[%c4_281, %c19_282] : memref<8x21xf32, #tpu.memory_space<smem>>
      %563 = vector.broadcast %562 : f32 to vector<8x256xf32>
      %564 = arith.mulf %563, %398 : vector<8x256xf32>
      %565 = arith.addf %561, %564 : vector<8x256xf32>
      %c4_283 = arith.constant 4 : index
      %c20_284 = arith.constant 20 : index
      %566 = memref.load %arg5[%c4_283, %c20_284] : memref<8x21xf32, #tpu.memory_space<smem>>
      %567 = vector.broadcast %566 : f32 to vector<8x256xf32>
      %568 = arith.addf %565, %567 : vector<8x256xf32>
      %c5_285 = arith.constant 5 : index
      %c12_286 = arith.constant 12 : index
      %569 = memref.load %arg5[%c5_285, %c12_286] : memref<8x21xf32, #tpu.memory_space<smem>>
      %570 = vector.broadcast %569 : f32 to vector<8x256xf32>
      %571 = arith.mulf %570, %146 : vector<8x256xf32>
      %c5_287 = arith.constant 5 : index
      %c13_288 = arith.constant 13 : index
      %572 = memref.load %arg5[%c5_287, %c13_288] : memref<8x21xf32, #tpu.memory_space<smem>>
      %573 = vector.broadcast %572 : f32 to vector<8x256xf32>
      %574 = arith.mulf %573, %182 : vector<8x256xf32>
      %575 = arith.addf %571, %574 : vector<8x256xf32>
      %c5_289 = arith.constant 5 : index
      %c14_290 = arith.constant 14 : index
      %576 = memref.load %arg5[%c5_289, %c14_290] : memref<8x21xf32, #tpu.memory_space<smem>>
      %577 = vector.broadcast %576 : f32 to vector<8x256xf32>
      %578 = arith.mulf %577, %218 : vector<8x256xf32>
      %579 = arith.addf %575, %578 : vector<8x256xf32>
      %c5_291 = arith.constant 5 : index
      %c15_292 = arith.constant 15 : index
      %580 = memref.load %arg5[%c5_291, %c15_292] : memref<8x21xf32, #tpu.memory_space<smem>>
      %581 = vector.broadcast %580 : f32 to vector<8x256xf32>
      %582 = arith.mulf %581, %254 : vector<8x256xf32>
      %583 = arith.addf %579, %582 : vector<8x256xf32>
      %c5_293 = arith.constant 5 : index
      %c16_294 = arith.constant 16 : index
      %584 = memref.load %arg5[%c5_293, %c16_294] : memref<8x21xf32, #tpu.memory_space<smem>>
      %585 = vector.broadcast %584 : f32 to vector<8x256xf32>
      %586 = arith.mulf %585, %290 : vector<8x256xf32>
      %587 = arith.addf %583, %586 : vector<8x256xf32>
      %c5_295 = arith.constant 5 : index
      %c17_296 = arith.constant 17 : index
      %588 = memref.load %arg5[%c5_295, %c17_296] : memref<8x21xf32, #tpu.memory_space<smem>>
      %589 = vector.broadcast %588 : f32 to vector<8x256xf32>
      %590 = arith.mulf %589, %326 : vector<8x256xf32>
      %591 = arith.addf %587, %590 : vector<8x256xf32>
      %c5_297 = arith.constant 5 : index
      %c18_298 = arith.constant 18 : index
      %592 = memref.load %arg5[%c5_297, %c18_298] : memref<8x21xf32, #tpu.memory_space<smem>>
      %593 = vector.broadcast %592 : f32 to vector<8x256xf32>
      %594 = arith.mulf %593, %362 : vector<8x256xf32>
      %595 = arith.addf %591, %594 : vector<8x256xf32>
      %c5_299 = arith.constant 5 : index
      %c19_300 = arith.constant 19 : index
      %596 = memref.load %arg5[%c5_299, %c19_300] : memref<8x21xf32, #tpu.memory_space<smem>>
      %597 = vector.broadcast %596 : f32 to vector<8x256xf32>
      %598 = arith.mulf %597, %398 : vector<8x256xf32>
      %599 = arith.addf %595, %598 : vector<8x256xf32>
      %c5_301 = arith.constant 5 : index
      %c20_302 = arith.constant 20 : index
      %600 = memref.load %arg5[%c5_301, %c20_302] : memref<8x21xf32, #tpu.memory_space<smem>>
      %601 = vector.broadcast %600 : f32 to vector<8x256xf32>
      %602 = arith.addf %599, %601 : vector<8x256xf32>
      %c6_303 = arith.constant 6 : index
      %c12_304 = arith.constant 12 : index
      %603 = memref.load %arg5[%c6_303, %c12_304] : memref<8x21xf32, #tpu.memory_space<smem>>
      %604 = vector.broadcast %603 : f32 to vector<8x256xf32>
      %605 = arith.mulf %604, %146 : vector<8x256xf32>
      %c6_305 = arith.constant 6 : index
      %c13_306 = arith.constant 13 : index
      %606 = memref.load %arg5[%c6_305, %c13_306] : memref<8x21xf32, #tpu.memory_space<smem>>
      %607 = vector.broadcast %606 : f32 to vector<8x256xf32>
      %608 = arith.mulf %607, %182 : vector<8x256xf32>
      %609 = arith.addf %605, %608 : vector<8x256xf32>
      %c6_307 = arith.constant 6 : index
      %c14_308 = arith.constant 14 : index
      %610 = memref.load %arg5[%c6_307, %c14_308] : memref<8x21xf32, #tpu.memory_space<smem>>
      %611 = vector.broadcast %610 : f32 to vector<8x256xf32>
      %612 = arith.mulf %611, %218 : vector<8x256xf32>
      %613 = arith.addf %609, %612 : vector<8x256xf32>
      %c6_309 = arith.constant 6 : index
      %c15_310 = arith.constant 15 : index
      %614 = memref.load %arg5[%c6_309, %c15_310] : memref<8x21xf32, #tpu.memory_space<smem>>
      %615 = vector.broadcast %614 : f32 to vector<8x256xf32>
      %616 = arith.mulf %615, %254 : vector<8x256xf32>
      %617 = arith.addf %613, %616 : vector<8x256xf32>
      %c6_311 = arith.constant 6 : index
      %c16_312 = arith.constant 16 : index
      %618 = memref.load %arg5[%c6_311, %c16_312] : memref<8x21xf32, #tpu.memory_space<smem>>
      %619 = vector.broadcast %618 : f32 to vector<8x256xf32>
      %620 = arith.mulf %619, %290 : vector<8x256xf32>
      %621 = arith.addf %617, %620 : vector<8x256xf32>
      %c6_313 = arith.constant 6 : index
      %c17_314 = arith.constant 17 : index
      %622 = memref.load %arg5[%c6_313, %c17_314] : memref<8x21xf32, #tpu.memory_space<smem>>
      %623 = vector.broadcast %622 : f32 to vector<8x256xf32>
      %624 = arith.mulf %623, %326 : vector<8x256xf32>
      %625 = arith.addf %621, %624 : vector<8x256xf32>
      %c6_315 = arith.constant 6 : index
      %c18_316 = arith.constant 18 : index
      %626 = memref.load %arg5[%c6_315, %c18_316] : memref<8x21xf32, #tpu.memory_space<smem>>
      %627 = vector.broadcast %626 : f32 to vector<8x256xf32>
      %628 = arith.mulf %627, %362 : vector<8x256xf32>
      %629 = arith.addf %625, %628 : vector<8x256xf32>
      %c6_317 = arith.constant 6 : index
      %c19_318 = arith.constant 19 : index
      %630 = memref.load %arg5[%c6_317, %c19_318] : memref<8x21xf32, #tpu.memory_space<smem>>
      %631 = vector.broadcast %630 : f32 to vector<8x256xf32>
      %632 = arith.mulf %631, %398 : vector<8x256xf32>
      %633 = arith.addf %629, %632 : vector<8x256xf32>
      %c6_319 = arith.constant 6 : index
      %c20_320 = arith.constant 20 : index
      %634 = memref.load %arg5[%c6_319, %c20_320] : memref<8x21xf32, #tpu.memory_space<smem>>
      %635 = vector.broadcast %634 : f32 to vector<8x256xf32>
      %636 = arith.addf %633, %635 : vector<8x256xf32>
      %637 = math.absf %432 : vector<8x256xf32>
      %638 = math.absf %466 : vector<8x256xf32>
      %cst_321 = arith.constant 2.000000e+01 : f32
      %639 = vector.broadcast %cst_321 : f32 to vector<8x256xf32>
      %640 = arith.minimumf %638, %639 : vector<8x256xf32>
      %cst_322 = arith.constant -2.000000e+01 : f32
      %cst_323 = arith.constant 2.000000e+01 : f32
      %641 = vector.broadcast %cst_322 : f32 to vector<8x256xf32>
      %642 = arith.maximumf %641, %534 : vector<8x256xf32>
      %643 = vector.broadcast %cst_323 : f32 to vector<8x256xf32>
      %644 = arith.minimumf %643, %642 : vector<8x256xf32>
      %cst_324 = arith.constant 1.000000e-03 : f32
      %645 = vector.broadcast %cst_324 : f32 to vector<8x256xf32>
      %646 = arith.mulf %645, %568 : vector<8x256xf32>
      %647 = math.absf %602 : vector<8x256xf32>
      %cst_325 = arith.constant 1.000000e-03 : f32
      %648 = vector.broadcast %cst_325 : f32 to vector<8x256xf32>
      %649 = arith.mulf %648, %647 : vector<8x256xf32>
      %cst_326 = arith.constant 1.000000e-03 : f32
      %650 = vector.broadcast %cst_326 : f32 to vector<8x256xf32>
      %651 = arith.mulf %650, %636 : vector<8x256xf32>
      %cst_327 = arith.constant 0.00999999977 : f32
      %652 = vector.broadcast %cst_327 : f32 to vector<8x256xf32>
      %653 = arith.mulf %652, %644 : vector<8x256xf32>
      %cst_328 = arith.constant 1.000000e+00 : f32
      %654 = vector.broadcast %cst_328 : f32 to vector<8x256xf32>
      %655 = arith.addf %654, %653 : vector<8x256xf32>
      %cst_329 = arith.constant 1.000000e+00 : f32
      %656 = vector.broadcast %cst_329 : f32 to vector<8x256xf32>
      %657 = arith.mulf %655, %656 : vector<8x256xf32>
      %cst_330 = arith.constant 0.00999999977 : f32
      %658 = vector.broadcast %cst_330 : f32 to vector<8x256xf32>
      %659 = arith.mulf %658, %640 : vector<8x256xf32>
      %cst_331 = arith.constant 8.000000e-01 : f32
      %660 = vector.broadcast %cst_331 : f32 to vector<8x256xf32>
      %661 = arith.addf %660, %659 : vector<8x256xf32>
      %cst_332 = arith.constant 2.000000e+00 : f32
      %662 = vector.broadcast %cst_332 : f32 to vector<8x256xf32>
      %663 = arith.mulf %661, %662 : vector<8x256xf32>
      %cst_333 = arith.constant 0.000000e+00 : f32
      %664 = vector.broadcast %cst_333 : f32 to vector<8x256xf32>
      %665 = arith.subf %664, %663 : vector<8x256xf32>
      %666 = arith.mulf %657, %12 : vector<8x256xf32>
      %667 = arith.subf %9, %666 : vector<8x256xf32>
      %668 = arith.mulf %665, %667 : vector<8x256xf32>
      %669 = math.exp %668 : vector<8x256xf32>
      %cst_334 = arith.constant 1.000000e+00 : f32
      %670 = vector.broadcast %cst_334 : f32 to vector<8x256xf32>
      %671 = arith.subf %670, %669 : vector<8x256xf32>
      %cst_335 = arith.constant 0.333333343 : f32
      %672 = vector.broadcast %cst_335 : f32 to vector<8x256xf32>
      %673 = math.powf %9, %672 : vector<8x256xf32>
      %674 = arith.mulf %671, %671 : vector<8x256xf32>
      %675 = arith.mulf %637, %674 : vector<8x256xf32>
      %676 = arith.mulf %646, %673 : vector<8x256xf32>
      %677 = arith.addf %675, %676 : vector<8x256xf32>
      %678 = arith.mulf %9, %9 : vector<8x256xf32>
      %679 = arith.mulf %651, %678 : vector<8x256xf32>
      %680 = arith.addf %677, %679 : vector<8x256xf32>
      %cst_336 = arith.constant 1.000000e+01 : f32
      %681 = vector.broadcast %cst_336 : f32 to vector<8x256xf32>
      %682 = arith.minimumf %680, %681 : vector<8x256xf32>
      %683 = arith.mulf %649, %9 : vector<8x256xf32>
      %684 = arith.subf %682, %683 : vector<8x256xf32>
      %685 = arith.addf %684, %500 : vector<8x256xf32>
      %686 = arith.index_cast %arg7 : i32 to index
      %c0_337 = arith.constant 0 : index
      %c0_338 = arith.constant 0 : index
      %687 = vector.load %arg6[%686, %c0_337, %c0_338] : memref<3x8x256xf32, #tpu.memory_space<vmem>>, vector<1x8x256xf32>
      %688 = vector.shape_cast %687 : vector<1x8x256xf32> to vector<8x256xf32>
      %689 = vector.shape_cast %685 : vector<8x256xf32> to vector<1x8x256xf32>
      tpu.vector_store %arg6[%686, %c0_337, %c0_338], %689 {strides = array<i32>} : memref<3x8x256xf32, #tpu.memory_space<vmem>>, vector<1x8x256xf32>,
    }
    %c3_i32_0 = arith.constant 3 : i32
    return
  }
  func.func @transform_0(%arg0: i32) -> (i32, i32, i32) {
    %c0_i32 = arith.constant 0 : i32
    %c0_i32_0 = arith.constant 0 : i32
    %c0_i32_1 = arith.constant 0 : i32
    return %arg0, %c0_i32, %c0_i32_0 : i32, i32, i32
  }
  func.func @transform_1(%arg0: i32) -> (i32, i32, i32) {
    %c0_i32 = arith.constant 0 : i32
    %c0_i32_0 = arith.constant 0 : i32
    %c0_i32_1 = arith.constant 0 : i32
    return %arg0, %c0_i32, %c0_i32_0 : i32, i32, i32
  }
  func.func @transform_2(%arg0: i32) -> (i32, i32, i32) {
    %c0_i32 = arith.constant 0 : i32
    %c0_i32_0 = arith.constant 0 : i32
    %c0_i32_1 = arith.constant 0 : i32
    return %arg0, %c0_i32, %c0_i32_0 : i32, i32, i32
  }
  func.func @transform_3(%arg0: i32) -> (i32, i32, i32) {
    %c0_i32 = arith.constant 0 : i32
    %c0_i32_0 = arith.constant 0 : i32
    %c0_i32_1 = arith.constant 0 : i32
    return %arg0, %c0_i32, %c0_i32_0 : i32, i32, i32
  }
  func.func @transform_4(%arg0: i32) -> (i32, i32) {
    %c0_i32 = arith.constant 0 : i32
    %c0_i32_0 = arith.constant 0 : i32
    %c0_i32_1 = arith.constant 0 : i32
    return %c0_i32, %c0_i32_0 : i32, i32
  }
  func.func @transform_5(%arg0: i32) -> (i32, i32, i32) {
    %c0_i32 = arith.constant 0 : i32
    %c0_i32_0 = arith.constant 0 : i32
    %c0_i32_1 = arith.constant 0 : i32
    return %arg0, %c0_i32, %c0_i32_0 : i32, i32, i32
  }
}

</mosaic_0001>

<bundles_post_ra>
// kernel: _morse_pallas.1
= control target key start
LH: loop header
LB: loop body
LE: loop exit
PB: predicated region body
PF: predicated region fallthrough
CT: control target
= control target key end

     0   :  { %10 = vsyncpa [#allocation3], 0  ;;  %s1782_s18 = smov 0   ;;  %s2814_s0 = inlined_call_operand.vmem [shape: f32[6,8,256], index: 0, kind: input, shape index: {}]   ;;  %s2815_s1 = inlined_call_operand.vmem [shape: f32[6,8,256], index: 1, kind: input, shape index: {}]   ;;  %s2816_s2 = inlined_call_operand.vmem [shape: f32[6,8,256], index: 2, kind: input, shape index: {}]   ;;  %s2817_s3 = inlined_call_operand.vmem [shape: f32[6,8,256], index: 3, kind: input, shape index: {}]   ;;  %s2818_s4 = inlined_call_operand.vmem [shape: f32[8,21], index: 4, kind: input, shape index: {}]   ;;  %s2819_s5 = inlined_call_operand.vmem [shape: f32[6,8,256], index: 5, kind: output, shape index: {}]  }
   0x1 LB: > { %s1434_s19 = sadd.s32 4294967295, %s1745_s18   ;;  %p1436_p0 = scmp.ge.s32.totalorder %s1745_s18, 1  ;;  %s1745_s18 = sphi %s1782_s18, %s16_s18  }
   0x2   : > { %p172_p1 = scmp.lt.s32.totalorder %s1745_s18, 3  ;;  %s184_s22 = sshll.u32 %s2818_s4, 4  ;;  %s185_s22 = int_to_ptr.vmem [resolvable:$true] %s184_s22 }
   0x3   : > { %p1685_p3 = scmp.eq.s32.totalorder %s1434_s19, 0  ;;  %s1751_s23 = smov [#allocation2]  }
   0x4   : > { %p173_p2 = pnand %p1436_p0, %p172_p1 }
   0x6   : > { %p1681_p4 = pneg %p173_p2  ;;  %237 = sbr.rel (%p173_p2) target bundleno = 251 (0xfb), region = 40 }
   0x8   : > { %p1682_p5 = pnand %p1685_p3, %p1681_p4 }
   0xa   : > { %1684 = dma.vmem_to_smem (!%p1682_p5), %s185_s22, 128, %s1751_s23, [#allocation3]  }
   0xb   : > { %1740 = dma.done.wait (%p1685_p3), [#allocation3], 128  }
   0xc   : > { %1742 = vsyncadd (%p1685_p3), [#allocation3], 4294967168 }
   0xd   : > { %244 = sfence }
   0xe   : > { %s287_s24 = smul.u32 3, %s1434_s19  ;;  %s1815_s16 = smov 0  }
  0x10   : > { %p288_p6 = scmp.lt.s32.totalorder %s287_s24, 5 }
  0x12   : > { %s2821_s24 = smov (!%p288_p6, %s287_s24), 5 }
  0x13   : > { %s1793_s25 = sshll.u32 %s2821_s24, 4 }
  0x14   : > { %s292_s28 = scalar_lea.vmem %s2814_s0, %s1793_s25  ;;  %s299_s6 = scalar_lea.vmem %s2815_s1, %s1793_s25 }
  0x15   : > { %s306_s9 = scalar_lea.vmem %s2816_s2, %s1793_s25  ;;  %s313_s12 = scalar_lea.vmem %s2817_s3, %s1793_s25 }
  0x16   : > { %s320_s15 = scalar_lea.vmem %s2819_s5, %s1793_s25 }
  0x17 LB: >> { %s1821_s17 = sshll.u32 %s1749_s16, 4  ;;  %s1823_s19 = sld [smem:[#allocation2]]  ;;  %s1749_s16 = sphi %s1815_s16, %s327_s16  }
  0x18   : >> { %s1825_s20 = sld [smem:[#allocation2 + $0x1]]  ;;  %s330_s23 = scalar_lea.vmem %s292_s28, %s1821_s17 }
  0x19   : >> { %s1833_s24 = sld [smem:[#allocation2 + $0x80]]  ;;  %s334_s29 = scalar_lea.vmem %s299_s6, %s1821_s17  ;;  %v331_v0 = vld [vmem:[%s330_s23] sm:$0xff]  ;;  %v332_v2 = vld [vmem:[%s330_s23 + $0x8] sm:$0xff] }
  0x1a   : >> { %s1841_s30 = sld [smem:[#allocation2 + $0x81]]  ;;  %v335_v1 = vld [vmem:[%s334_s29] sm:$0xff]  ;;  %v336_v3 = vld [vmem:[%s334_s29 + $0x8] sm:$0xff]  ;;  %s327_s16 = sadd.s32 1, %s1749_s16  }
  0x1b   : >> { %s1843_s7 = sld [smem:[#allocation2 + $0x100]]  ;;  %v1851_v4 = vadd.f32 %v335_v1, %v331_v0  ;;  %v1853_v5 = vmul.f32 %v335_v1, %v331_v0  ;;  %v1857_v6 = vadd.f32 %v336_v3, %v332_v2  ;;  %v1859_v7 = vmul.f32 %v336_v3, %v332_v2  ;;  %p324_p7 = scmp.ge.s32.totalorder %s327_s16, 3  }
  0x1c   : >> { %s1845_s8 = sld [smem:[#allocation2 + $0x101]] }
  0x1d   : >> { %s1847_s10 = sld [smem:[#allocation2 + $0x180]]  ;;  %v350_v8 = vstv %s1823_s19 }
  0x1e   : >> { %s1849_s11 = sld [smem:[#allocation2 + $0x181]]  ;;  %v354_v9 = vstv %s1825_s20  ;;  %v351_v12 = vmul.f32 %v350_v8, %v1851_v4  ;;  %v352_v16 = vmul.f32 %v350_v8, %v1857_v6 }
  0x1f   : >> { %s1855_s13 = sld [smem:[#allocation2 + $0x2]]  ;;  %v366_v10 = vstv %s1833_s24  ;;  %v355_v13 = vmul.f32 %v354_v9, %v1853_v5  ;;  %v356_v17 = vmul.f32 %v354_v9, %v1859_v7 }
  0x20   : >> { %s1863_s14 = sld [smem:[#allocation2 + $0x82]]  ;;  %v370_v11 = vstv %s1841_s30  ;;  %v367_v18 = vmul.f32 %v366_v10, %v1851_v4  ;;  %v368_v19 = vmul.f32 %v366_v10, %v1857_v6 }
  0x21   : >> { %s1866_s21 = sld [smem:[#allocation2 + $0x102]]  ;;  %v382_v14 = vstv %s1843_s7  ;;  %v371_v20 = vmul.f32 %v370_v11, %v1853_v5  ;;  %v372_v21 = vmul.f32 %v370_v11, %v1859_v7  ;;  %v357_v28 = vadd.f32 %v355_v13, %v351_v12 }
  0x22   : >> { %s1869_s22 = sld [smem:[#allocation2 + $0x200]]  ;;  %v386_v15 = vstv %s1845_s8  ;;  %v383_v24 = vmul.f32 %v382_v14, %v1851_v4  ;;  %v384_v25 = vmul.f32 %v382_v14, %v1857_v6  ;;  %v358_v33 = vadd.f32 %v356_v17, %v352_v16 }
  0x23   : >> { %s1875_s23 = sld [smem:[#allocation2 + $0x201]]  ;;  %v398_v22 = vstv %s1847_s10  ;;  %v387_v26 = vmul.f32 %v386_v15, %v1853_v5  ;;  %v388_v27 = vmul.f32 %v386_v15, %v1859_v7  ;;  %v373_v35 = vadd.f32 %v371_v20, %v367_v18 }
  0x24   : >> { %s1881_s19 = sld [smem:[#allocation2 + $0x182]]  ;;  %v402_v23 = vstv %s1849_s11  ;;  %v399_v29 = vmul.f32 %v398_v22, %v1851_v4  ;;  %v400_v30 = vmul.f32 %v398_v22, %v1857_v6  ;;  %v374_v36 = vadd.f32 %v372_v21, %v368_v19 }
  0x25   : >> { %s1887_s20 = sld [smem:[#allocation2 + $0x202]]  ;;  %v403_v31 = vmul.f32 %v402_v23, %v1853_v5  ;;  %v404_v32 = vmul.f32 %v402_v23, %v1859_v7  ;;  %v360_v34 = vstv %s1855_s13  ;;  %v389_v38 = vadd.f32 %v387_v26, %v383_v24 }
  0x26   : >> { %s1893_s24 = sld [smem:[#allocation2 + $0x280]]  ;;  %v376_v37 = vstv %s1863_s14  ;;  %v390_v39 = vadd.f32 %v388_v27, %v384_v25  ;;  %v361_v43 = vadd.f32 %v360_v34, %v357_v28  ;;  %v362_v46 = vadd.f32 %v360_v34, %v358_v33 }
  0x27   : >> { %s1895_s26 = sld [smem:[#allocation2 + $0x281]]  ;;  %v392_v40 = vstv %s1866_s21  ;;  %v405_v44 = vadd.f32 %v403_v31, %v399_v29  ;;  %v406_v45 = vadd.f32 %v404_v32, %v400_v30  ;;  %v377_v47 = vadd.f32 %v376_v37, %v373_v35 }
  0x28   : >> { %s1901_s27 = sld [smem:[#allocation2 + $0x282]]  ;;  %v414_v41 = vstv %s1869_s22  ;;  %v378_v48 = vadd.f32 %v376_v37, %v374_v36  ;;  %v393_v50 = vadd.f32 %v392_v40, %v389_v38  ;;  %v394_v51 = vadd.f32 %v392_v40, %v390_v39 }
  0x29   : >> { %s1904_s29 = sld [smem:[#allocation2 + $0x300]]  ;;  %v418_v42 = vstv %s1875_s23  ;;  %v415_v52 = vmul.f32 %v414_v41, %v1851_v4  ;;  %v416_v54 = vmul.f32 %v414_v41, %v1857_v6  ;;  %v1928_v59 = vmax.f32 %v361_v43, 0.0 }
  0x2a   : >> { %s1907_s30 = sld [smem:[#allocation2 + $0x301]]  ;;  %v408_v49 = vstv %s1881_s19  ;;  %v419_v53 = vmul.f32 %v418_v42, %v1853_v5  ;;  %v420_v55 = vmul.f32 %v418_v42, %v1859_v7  ;;  %v1930_v60 = vmax.f32 %v362_v46, 0.0 }
  0x2b   : >> { %s1912_s7 = sld [smem:[#allocation2 + $0x3]]  ;;  %v409_v56 = vadd.f32 %v408_v49, %v405_v44  ;;  %v410_v57 = vadd.f32 %v408_v49, %v406_v45  ;;  %v1932_v61 = vmax.f32 %v377_v47, 0.0  ;;  %v1934_v62 = vmax.f32 %v378_v48, 0.0 }
  0x2c   : >> { %s1914_s8 = sld [smem:[#allocation2 + $0x4]]  ;;  %v430_v58 = vstv %s1893_s24  ;;  %v1936_v63 = vmax.f32 %v393_v50, 0.0  ;;  %v1938_v0 = vmax.f32 %v394_v51, 0.0  ;;  %v421_v1 = vadd.f32 %v419_v53, %v415_v52 }
  0x2d   : >> { %s1917_s10 = sld [smem:[#allocation2 + $0x380]]  ;;  %v434_v2 = vstv %s1895_s26  ;;  %v422_v3 = vadd.f32 %v420_v55, %v416_v54  ;;  %v424_v8 = vstv %s1887_s20  ;;  %v431_v9 = vmul.f32 %v430_v58, %v1851_v4 }
  0x2e   : >> { %s1921_s11 = sld [smem:[#allocation2 + $0x381]]  ;;  %v432_v10 = vmul.f32 %v430_v58, %v1857_v6  ;;  %v1946_v11 = vmax.f32 %v409_v56, 0.0  ;;  %v1948_v12 = vmax.f32 %v410_v57, 0.0  ;;  %v435_v15 = vmul.f32 %v434_v2, %v1853_v5 }
  0x2f   : >> { %s1926_s13 = sld [smem:[#allocation2 + $0x5]]  ;;  %v436_v16 = vmul.f32 %v434_v2, %v1859_v7  ;;  %v446_v17 = vstv %s1904_s29  ;;  %v425_v19 = vadd.f32 %v424_v8, %v421_v1  ;;  %v440_v20 = vstv %s1901_s27 }
  0x30   : >> { %s1944_s14 = sld [smem:[#allocation2 + $0x302]]  ;;  %v450_v18 = vstv %s1907_s30  ;;  %v426_v27 = vadd.f32 %v424_v8, %v422_v3  ;;  %v447_v28 = vmul.f32 %v446_v17, %v1851_v4  ;;  %v437_v31 = vadd.f32 %v435_v15, %v431_v9 }
  0x31   : >> { %v478_v13 = vstv %s1912_s7  ;;  %s1952_s21 = sld [smem:[#allocation2 + $0x6]]  ;;  %v451_v29 = vmul.f32 %v450_v18, %v1853_v5  ;;  %v438_v32 = vadd.f32 %v436_v16, %v432_v10  ;;  %v448_v33 = vmul.f32 %v446_v17, %v1857_v6 }
  0x32   : >> { %v482_v14 = vstv %s1914_s8  ;;  %s1958_s22 = sld [smem:[#allocation2 + $0x382]]  ;;  %v479_v23 = vmul.f32 %v478_v13, %v1928_v59  ;;  %v480_v24 = vmul.f32 %v478_v13, %v1930_v60  ;;  %v452_v34 = vmul.f32 %v450_v18, %v1859_v7 }
  0x33   : >> { %v462_v21 = vstv %s1917_s10  ;;  %s1963_s23 = sld [smem:[#allocation2 + $0x7]]  ;;  %v483_v25 = vmul.f32 %v482_v14, %v1932_v61  ;;  %v484_v26 = vmul.f32 %v482_v14, %v1934_v62  ;;  %v1986_v43 = vmax.f32 %v425_v19, 0.0 }
  0x34   : >> { %v466_v22 = vstv %s1921_s11  ;;  %s1974_s19 = sld [smem:[#allocation2 + $0x8]]  ;;  %v463_v35 = vmul.f32 %v462_v21, %v1851_v4  ;;  %v464_v36 = vmul.f32 %v462_v21, %v1857_v6  ;;  %v453_v4 = vadd.f32 %v451_v29, %v447_v28 }
  0x35   : >> { %v488_v30 = vstv %s1926_s13  ;;  %v467_v37 = vmul.f32 %v466_v22, %v1853_v5  ;;  %v468_v38 = vmul.f32 %v466_v22, %v1859_v7  ;;  %s1980_s20 = sld [smem:[#allocation2 + $0x9]]  ;;  %v485_v39 = vadd.f32 %v483_v25, %v479_v23 }
  0x36   : >> { %v486_v40 = vadd.f32 %v484_v26, %v480_v24  ;;  %v489_v41 = vmul.f32 %v488_v30, %v1936_v63  ;;  %v490_v42 = vmul.f32 %v488_v30, %v1938_v0  ;;  %s1984_s24 = sld [smem:[#allocation2 + $0xa]]  ;;  %v456_v6 = vstv %s1944_s14 }
  0x37   : >> { %v494_v44 = vstv %s1952_s21  ;;  %s1990_s26 = sld [smem:[#allocation2 + $0x83]]  ;;  %v1992_v5 = vmax.f32 %v426_v27, 0.0  ;;  %v441_v7 = vadd.f32 %v440_v20, %v437_v31  ;;  %v442_v45 = vadd.f32 %v440_v20, %v438_v32 }
  0x38   : >> { %v454_v46 = vadd.f32 %v452_v34, %v448_v33  ;;  %s1994_s27 = sld [smem:[#allocation2 + $0x84]]  ;;  %v469_v47 = vadd.f32 %v467_v37, %v463_v35  ;;  %v470_v48 = vadd.f32 %v468_v38, %v464_v36  ;;  %v472_v49 = vstv %s1958_s22 }
  0x39   : >> { %v500_v50 = vstv %s1963_s23  ;;  %s1998_s29 = sld [smem:[#allocation2 + $0xb]]  ;;  %v491_v51 = vadd.f32 %v489_v41, %v485_v39  ;;  %v492_v52 = vadd.f32 %v490_v42, %v486_v40  ;;  %v495_v53 = vmul.f32 %v494_v44, %v1946_v11 }
  0x3a   : >> { %v496_v54 = vmul.f32 %v494_v44, %v1948_v12  ;;  %s2002_s30 = sld [smem:[#allocation2 + $0x85]]  ;;  %v457_v55 = vadd.f32 %v456_v6, %v453_v4  ;;  %v2006_v56 = vmax.f32 %v441_v7, 0.0  ;;  %v458_v57 = vadd.f32 %v456_v6, %v454_v46 }
  0x3b   : >> { %s2004_s7 = sld [smem:[#allocation2 + $0x86]]  ;;  %v2010_v58 = vmax.f32 %v442_v45, 0.0  ;;  %v473_v1 = vadd.f32 %v472_v49, %v469_v47  ;;  %v474_v2 = vadd.f32 %v472_v49, %v470_v48  ;;  %v501_v3 = vmul.f32 %v500_v50, %v1986_v43 }
  0x3c   : >> { %s2008_s8 = sld [smem:[#allocation2 + $0x103]]  ;;  %v497_v8 = vadd.f32 %v495_v53, %v491_v51  ;;  %v498_v9 = vadd.f32 %v496_v54, %v492_v52  ;;  %v502_v10 = vmul.f32 %v500_v50, %v1992_v5  ;;  %v506_v13 = vstv %s1974_s19 }
  0x3d   : >> { %s2013_s10 = sld [smem:[#allocation2 + $0x104]]  ;;  %v2019_v14 = vmax.f32 %v457_v55, 0.0  ;;  %v2023_v15 = vmax.f32 %v458_v57, 0.0  ;;  %v512_v16 = vstv %s1980_s20  ;;  %v530_v17 = vstv %s1990_s26 }
  0x3e   : >> { %s2017_s11 = sld [smem:[#allocation2 + $0x183]]  ;;  %v534_v18 = vstv %s1994_s27  ;;  %v2030_v19 = vmax.f32 %v473_v1, 0.0  ;;  %v2032_v20 = vmax.f32 %v474_v2, 0.0  ;;  %v507_v21 = vmul.f32 %v506_v13, %v2006_v56 }
  0x3f   : >> { %s2021_s13 = sld [smem:[#allocation2 + $0x184]]  ;;  %v503_v22 = vadd.f32 %v501_v3, %v497_v8  ;;  %v504_v23 = vadd.f32 %v502_v10, %v498_v9  ;;  %v508_v24 = vmul.f32 %v506_v13, %v2010_v58  ;;  %v518_v25 = vstv %s1984_s24 }
  0x40   : >> { %s2028_s14 = sld [smem:[#allocation2 + $0x87]]  ;;  %v513_v26 = vmul.f32 %v512_v16, %v2019_v14  ;;  %v531_v27 = vmul.f32 %v530_v17, %v1928_v59  ;;  %v535_v28 = vmul.f32 %v534_v18, %v1932_v61  ;;  %v514_v29 = vmul.f32 %v512_v16, %v2023_v15 }
  0x41   : >> { %s2035_s21 = sld [smem:[#allocation2 + $0x105]]  ;;  %v532_v30 = vmul.f32 %v530_v17, %v1930_v60  ;;  %v536_v31 = vmul.f32 %v534_v18, %v1934_v62  ;;  %v540_v32 = vstv %s2002_s30  ;;  %v2053_v33 = vmul.f32 %v518_v25, %v2030_v19 }
  0x42   : >> { %s2039_s22 = sld [smem:[#allocation2 + $0x88]]  ;;  %v524_v34 = vstv %s1998_s29  ;;  %v546_v35 = vstv %s2004_s7  ;;  %v582_v36 = vstv %s2008_s8  ;;  %v509_v37 = vadd.f32 %v507_v21, %v503_v22 }
  0x43   : >> { %s2044_s23 = sld [smem:[#allocation2 + $0x185]]  ;;  %v510_v38 = vadd.f32 %v508_v24, %v504_v23  ;;  %v2059_v39 = vmul.f32 %v518_v25, %v2032_v20  ;;  %v586_v40 = vstv %s2013_s10  ;;  %v537_v41 = vadd.f32 %v535_v28, %v531_v27 }
  0x44   : >> { %s2050_s19 = sld [smem:[#allocation2 + $0x106]]  ;;  %v541_v42 = vmul.f32 %v540_v32, %v1936_v63  ;;  %v634_v4 = vstv %s2017_s11  ;;  %v538_v44 = vadd.f32 %v536_v31, %v532_v30  ;;  %v542_v7 = vmul.f32 %v540_v32, %v1938_v0 }
  0x45   : >> { %s2061_s20 = sld [smem:[#allocation2 + $0x89]]  ;;  %v638_v6 = vstv %s2021_s13  ;;  %v547_v45 = vmul.f32 %v546_v35, %v1946_v11  ;;  %v583_v46 = vmul.f32 %v582_v36, %v1928_v59  ;;  %v584_v47 = vmul.f32 %v582_v36, %v1930_v60 }
  0x46   : >> { %s2067_s24 = sld [smem:[#allocation2 + $0x186]]  ;;  %v587_v48 = vmul.f32 %v586_v40, %v1932_v61  ;;  %v588_v49 = vmul.f32 %v586_v40, %v1934_v62  ;;  %v2078_v51 = vadd.f32 %v513_v26, %v509_v37  ;;  %v548_v52 = vmul.f32 %v546_v35, %v1948_v12 }
  0x47   : >> { %s2072_s26 = sld [smem:[#allocation2 + $0x107]]  ;;  %v592_v50 = vstv %s2035_s21  ;;  %v635_v53 = vmul.f32 %v634_v4, %v1928_v59  ;;  %v639_v54 = vmul.f32 %v638_v6, %v1932_v61  ;;  %v2085_v55 = vadd.f32 %v514_v29, %v510_v38 }
  0x48   : >> { %s2081_s27 = sld [smem:[#allocation2 + $0x8a]]  ;;  %v543_v57 = vadd.f32 %v541_v42, %v537_v41  ;;  %v552_v1 = vstv %s2028_s14  ;;  %v558_v3 = vstv %s2039_s22  ;;  %v593_v8 = vmul.f32 %v592_v50, %v1936_v63 }
  0x49   : >> { %v644_v2 = vstv %s2044_s23  ;;  %s2089_s30 = sld [smem:[#allocation2 + $0x187]]  ;;  %v594_v9 = vmul.f32 %v592_v50, %v1938_v0  ;;  %v589_v13 = vadd.f32 %v587_v48, %v583_v46  ;;  %v590_v16 = vadd.f32 %v588_v49, %v584_v47 }
  0x4a   : >> { %v598_v10 = vstv %s2050_s19  ;;  %s2095_s7 = sld [smem:[#allocation2 + $0x108]]  ;;  %v636_v17 = vmul.f32 %v634_v4, %v1930_v60  ;;  %v640_v18 = vmul.f32 %v638_v6, %v1934_v62  ;;  %v544_v21 = vadd.f32 %v542_v7, %v538_v44 }
  0x4b   : >> { %s2097_s8 = sld [smem:[#allocation2 + $0x109]]  ;;  %v553_v22 = vmul.f32 %v552_v1, %v1986_v43  ;;  %v641_v23 = vadd.f32 %v639_v54, %v635_v53  ;;  %v645_v24 = vmul.f32 %v644_v2, %v1936_v63  ;;  %v549_v25 = vadd.f32 %v547_v45, %v543_v57 }
  0x4c   : >> { %s2103_s10 = sld [smem:[#allocation2 + $0x188]]  ;;  %v554_v26 = vmul.f32 %v552_v1, %v1992_v5  ;;  %v559_v27 = vmul.f32 %v558_v3, %v2006_v56  ;;  %v650_v28 = vstv %s2067_s24  ;;  %v564_v29 = vstv %s2061_s20 }
  0x4d   : >> { %s2108_s11 = sld [smem:[#allocation2 + $0x203]]  ;;  %v599_v30 = vmul.f32 %v598_v10, %v1946_v11  ;;  %v600_v31 = vmul.f32 %v598_v10, %v1948_v12  ;;  %v604_v32 = vstv %s2072_s26  ;;  %v595_v35 = vadd.f32 %v593_v8, %v589_v13 }
  0x4e   : >> { %s2114_s13 = sld [smem:[#allocation2 + $0x204]]  ;;  %v596_v36 = vadd.f32 %v594_v9, %v590_v16  ;;  %v642_v37 = vadd.f32 %v640_v18, %v636_v17  ;;  %v646_v38 = vmul.f32 %v644_v2, %v1938_v0  ;;  %v550_v40 = vadd.f32 %v548_v52, %v544_v21 }
  0x4f   : >> { %v560_v41 = vmul.f32 %v558_v3, %v2010_v58  ;;  %s2118_s14 = sld [smem:[#allocation2 + $0x10a]]  ;;  %v647_v42 = vadd.f32 %v645_v24, %v641_v23  ;;  %v651_v4 = vmul.f32 %v650_v28, %v1946_v11  ;;  %v555_v6 = vadd.f32 %v553_v22, %v549_v25 }
  0x50   : >> { %v565_v44 = vmul.f32 %v564_v29, %v2019_v14  ;;  %v570_v7 = vstv %s2081_s27  ;;  %v656_v45 = vstv %s2089_s30  ;;  %s2124_s21 = sld [smem:[#allocation2 + $0x189]]  ;;  %v566_v46 = vmul.f32 %v564_v29, %v2023_v15 }
  0x51   : >> { %v605_v47 = vmul.f32 %v604_v32, %v1986_v43  ;;  %v606_v48 = vmul.f32 %v604_v32, %v1992_v5  ;;  %v610_v49 = vstv %s2095_s7  ;;  %s2130_s22 = sld [smem:[#allocation2 + $0x205]]  ;;  %v601_v50 = vadd.f32 %v599_v30, %v595_v35 }
  0x52   : >> { %v602_v52 = vadd.f32 %v600_v31, %v596_v36  ;;  %v648_v53 = vadd.f32 %v646_v38, %v642_v37  ;;  %v652_v54 = vmul.f32 %v650_v28, %v1948_v12  ;;  %v556_v57 = vadd.f32 %v554_v26, %v550_v40  ;;  %s2138_s23 = sld [smem:[#allocation2 + $0x18a]] }
  0x53   : >> { %v571_v1 = vmul.f32 %v570_v7, %v2030_v19  ;;  %v653_v2 = vadd.f32 %v651_v4, %v647_v42  ;;  %v657_v3 = vmul.f32 %v656_v45, %v1986_v43  ;;  %v561_v8 = vadd.f32 %v559_v27, %v555_v6  ;;  %s2144_s19 = sld [smem:[#allocation2 + $0x206]] }
  0x54   : >> { %v572_v9 = vmul.f32 %v570_v7, %v2032_v20  ;;  %v616_v10 = vstv %s2097_s8  ;;  %v662_v13 = vstv %s2103_s10  ;;  %v611_v16 = vmul.f32 %v610_v49, %v2006_v56  ;;  %s2149_s20 = sld [smem:[#allocation2 + $0x8b]] }
  0x55   : >> { %v612_v17 = vmul.f32 %v610_v49, %v2010_v58  ;;  %v686_v18 = vstv %s2108_s11  ;;  %v690_v21 = vstv %s2114_s13  ;;  %v607_v22 = vadd.f32 %v605_v47, %v601_v50  ;;  %s2159_s24 = sld [smem:[#allocation2 + $0x207]] }
  0x56   : >> { %v608_v23 = vadd.f32 %v606_v48, %v602_v52  ;;  %v654_v24 = vadd.f32 %v652_v54, %v648_v53  ;;  %v658_v25 = vmul.f32 %v656_v45, %v1992_v5  ;;  %v562_v26 = vadd.f32 %v560_v41, %v556_v57  ;;  %s2161_s26 = sld [smem:[#allocation2 + $0x10b]] }
  0x57   : >> { %v617_v27 = vmul.f32 %v616_v10, %v2019_v14  ;;  %v659_v28 = vadd.f32 %v657_v3, %v653_v2  ;;  %v663_v29 = vmul.f32 %v662_v13, %v2006_v56  ;;  %v618_v30 = vmul.f32 %v616_v10, %v2023_v15  ;;  %s2165_s27 = sld [smem:[#allocation2 + $0x18b]] }
  0x58   : >> { %v668_v31 = vstv %s2124_s21  ;;  %v687_v32 = vmul.f32 %v686_v18, %v1928_v59  ;;  %v691_v35 = vmul.f32 %v690_v21, %v1932_v61  ;;  %v622_v36 = vstv %s2118_s14  ;;  %s2170_s30 = sld [smem:[#allocation2 + $0x208]] }
  0x59   : >> { %v688_v37 = vmul.f32 %v686_v18, %v1930_v60  ;;  %v692_v38 = vmul.f32 %v690_v21, %v1934_v62  ;;  %v696_v40 = vstv %s2130_s22  ;;  %v613_v41 = vadd.f32 %v611_v16, %v607_v22  ;;  %s2175_s7 = sld [smem:[#allocation2 + $0x209]] }
  0x5a   : >> { %v614_v42 = vadd.f32 %v612_v17, %v608_v23  ;;  %v660_v4 = vadd.f32 %v658_v25, %v654_v24  ;;  %v664_v6 = vmul.f32 %v662_v13, %v2010_v58  ;;  %v567_v7 = vadd.f32 %v565_v44, %v561_v8  ;;  %s2178_s8 = sld [smem:[#allocation2 + $0x20a]] }
  0x5b   : >> { %v568_v45 = vadd.f32 %v566_v46, %v562_v26  ;;  %v665_v47 = vadd.f32 %v663_v29, %v659_v28  ;;  %v669_v48 = vmul.f32 %v668_v31, %v2019_v14  ;;  %v623_v49 = vmul.f32 %v622_v36, %v2030_v19  ;;  %s2185_s10 = sld [smem:[#allocation2 + $0x20b]] }
  0x5c   : >> { %v674_v50 = vstv %s2138_s23  ;;  %v693_v52 = vadd.f32 %v691_v35, %v687_v32  ;;  %v697_v53 = vmul.f32 %v696_v40, %v1936_v63  ;;  %v624_v54 = vmul.f32 %v622_v36, %v2032_v20  ;;  %s2189_s11 = sld [smem:[#allocation2 + $0x283]] }
  0x5d   : >> { %v694_v57 = vadd.f32 %v692_v38, %v688_v37  ;;  %v698_v44 = vmul.f32 %v696_v40, %v1938_v0  ;;  %v702_v46 = vstv %s2144_s19  ;;  %v619_v2 = vadd.f32 %v617_v27, %v613_v41  ;;  %s2193_s13 = sld [smem:[#allocation2 + $0x284]] }
  0x5e   : >> { %v620_v3 = vadd.f32 %v618_v30, %v614_v42  ;;  %v666_v8 = vadd.f32 %v664_v6, %v660_v4  ;;  %v670_v10 = vmul.f32 %v668_v31, %v2023_v15  ;;  %v521_v13 = vadd.f32 %v2053_v33, %v2078_v51  ;;  %s2196_s14 = sld [smem:[#allocation2 + $0x285]] }
  0x5f   : >> { %v522_v16 = vadd.f32 %v2059_v39, %v2085_v55  ;;  %v671_v17 = vadd.f32 %v669_v48, %v665_v47  ;;  %v675_v18 = vmul.f32 %v674_v50, %v2030_v19  ;;  %v573_v21 = vadd.f32 %v571_v1, %v567_v7  ;;  %s2203_s21 = sld [smem:[#allocation2 + $0x286]] }
  0x60   : >> { %v576_v22 = vstv %s2149_s20  ;;  %v699_v23 = vadd.f32 %v697_v53, %v693_v52  ;;  %v703_v24 = vmul.f32 %v702_v46, %v1946_v11  ;;  %v574_v25 = vadd.f32 %v572_v9, %v568_v45  ;;  %s2207_s22 = sld [smem:[#allocation2 + $0x303]] }
  0x61   : >> { %v700_v33 = vadd.f32 %v698_v44, %v694_v57  ;;  %v704_v39 = vmul.f32 %v702_v46, %v1948_v12  ;;  %v708_v51 = vstv %s2159_s24  ;;  %v625_v55 = vadd.f32 %v623_v49, %v619_v2  ;;  %s2211_s23 = sld [smem:[#allocation2 + $0x304]] }
  0x62   : >> { %v626_v26 = vadd.f32 %v624_v54, %v620_v3  ;;  %v672_v27 = vadd.f32 %v670_v10, %v666_v8  ;;  %v676_v1 = vmul.f32 %v674_v50, %v2032_v20  ;;  %v525_v28 = vadd.f32 %v524_v34, %v521_v13  ;;  %s2215_s29 = sld [smem:[#allocation2 + $0x287]] }
  0x63   : >> { %v526_v29 = vadd.f32 %v524_v34, %v522_v16  ;;  %v628_v9 = vstv %s2161_s26  ;;  %v677_v30 = vadd.f32 %v675_v18, %v671_v17  ;;  %v577_v31 = vadd.f32 %v576_v22, %v573_v21  ;;  %s2222_s19 = sld [smem:[#allocation2 + $0x305]] }
  0x64   : >> { %v680_v32 = vstv %s2165_s27  ;;  %v705_v35 = vadd.f32 %v703_v24, %v699_v23  ;;  %v709_v36 = vmul.f32 %v708_v51, %v1986_v43  ;;  %v578_v37 = vadd.f32 %v576_v22, %v574_v25  ;;  %s2228_s20 = sld [smem:[#allocation2 + $0x383]] }
  0x65   : >> { %v706_v38 = vadd.f32 %v704_v39, %v700_v33  ;;  %v710_v40 = vmul.f32 %v708_v51, %v1992_v5  ;;  %v714_v41 = vstv %s2170_s30  ;;  %v629_v34 = vadd.f32 %v628_v9, %v625_v55  ;;  %s2235_s24 = sld [smem:[#allocation2 + $0x384]] }
  0x66   : >> { %v630_v42 = vadd.f32 %v628_v9, %v626_v26  ;;  %v678_v4 = vadd.f32 %v676_v1, %v672_v27  ;;  %v2213_v6 = vmax.f32 %v525_v28, 0.0  ;;  %v681_v7 = vadd.f32 %v680_v32, %v677_v30  ;;  %s2242_s26 = sld [smem:[#allocation2 + $0x288]] }
  0x67   : >> { %v2217_v45 = vmax.f32 %v526_v29, 0.0  ;;  %v2219_v47 = vmax.f32 %v577_v31, 0.0  ;;  %v711_v48 = vadd.f32 %v709_v36, %v705_v35  ;;  %v715_v49 = vmul.f32 %v714_v41, %v2006_v56  ;;  %s2247_s27 = sld [smem:[#allocation2 + $0x306]] }
  0x68   : >> { %v2224_v50 = vmax.f32 %v578_v37, 0.0  ;;  %v712_v52 = vadd.f32 %v710_v40, %v706_v38  ;;  %v716_v53 = vmul.f32 %v714_v41, %v2010_v58  ;;  %v720_v54 = vstv %s2175_s7  ;;  %s2256_s30 = sld [smem:[#allocation2 + $0x385]] }
  0x69   : >> { %v2230_v57 = vmax.f32 %v629_v34, 0.0  ;;  %v2232_v44 = vmax.f32 %v630_v42, 0.0  ;;  %v682_v46 = vadd.f32 %v680_v32, %v678_v4  ;;  %v726_v2 = vstv %s2178_s8  ;;  %s2266_s7 = sld [smem:[#allocation2 + $0x307]] }
  0x6a   : >> { %v2237_v3 = vmax.f32 %v681_v7, 0.0  ;;  %v732_v8 = vstv %s2185_s10  ;;  %v738_v10 = vstv %s2189_s11  ;;  %v742_v13 = vstv %s2193_s13  ;;  %s2273_s8 = sld [smem:[#allocation2 + $0x386]] }
  0x6b   : >> { %v717_v16 = vadd.f32 %v715_v49, %v711_v48  ;;  %v721_v17 = vmul.f32 %v720_v54, %v2019_v14  ;;  %v722_v18 = vmul.f32 %v720_v54, %v2023_v15  ;;  %v748_v21 = vstv %s2196_s14  ;;  %s2277_s11 = sld [smem:[#allocation2 + $0x289]] }
  0x6c   : >> { %v718_v22 = vadd.f32 %v716_v53, %v712_v52  ;;  %v754_v23 = vstv %s2203_s21  ;;  %v790_v24 = vstv %s2207_s22  ;;  %v794_v25 = vstv %s2211_s23  ;;  %s2283_s13 = sld [smem:[#allocation2 + $0x308]] }
  0x6d   : >> { %v739_v33 = vmul.f32 %v738_v10, %v1928_v59  ;;  %v740_v39 = vmul.f32 %v738_v10, %v1930_v60  ;;  %v743_v51 = vmul.f32 %v742_v13, %v1932_v61  ;;  %v744_v55 = vmul.f32 %v742_v13, %v1934_v62  ;;  %s2285_s14 = sld [smem:[#allocation2 + $0x28a]] }
  0x6e   : >> { %v2258_v26 = vmax.f32 %v682_v46, 0.0  ;;  %v727_v27 = vmul.f32 %v726_v2, %v2030_v19  ;;  %v728_v1 = vmul.f32 %v726_v2, %v2032_v20  ;;  %v749_v28 = vmul.f32 %v748_v21, %v1936_v63  ;;  %s2292_s21 = sld [smem:[#allocation2 + $0x387]] }
  0x6f   : >> { %v723_v29 = vadd.f32 %v721_v17, %v717_v16  ;;  %v750_v9 = vmul.f32 %v748_v21, %v1938_v0  ;;  %v791_v30 = vmul.f32 %v790_v24, %v1928_v59  ;;  %v795_v31 = vmul.f32 %v794_v25, %v1932_v61  ;;  %s2297_s22 = sld [smem:[#allocation2 + $0x309]] }
  0x70   : >> { %v724_v32 = vadd.f32 %v722_v18, %v718_v22  ;;  %v755_v35 = vmul.f32 %v754_v23, %v1946_v11  ;;  %v756_v36 = vmul.f32 %v754_v23, %v1948_v12  ;;  %v800_v37 = vstv %s2222_s19  ;;  %s2302_s23 = sld [smem:[#allocation2 + $0x388]] }
  0x71   : >> { %v745_v38 = vadd.f32 %v743_v51, %v739_v33  ;;  %v746_v40 = vadd.f32 %v744_v55, %v740_v39  ;;  %v842_v41 = vstv %s2228_s20  ;;  %v846_v34 = vstv %s2235_s24  ;;  %s2319_s19 = sld [smem:[#allocation2 + $0xd]] }
  0x72   : >> { %v760_v42 = vstv %s2215_s29  ;;  %v766_v4 = vstv %s2242_s26  ;;  %v792_v7 = vmul.f32 %v790_v24, %v1930_v60  ;;  %v796_v48 = vmul.f32 %v794_v25, %v1934_v62  ;;  %s2308_s29 = sld [smem:[#allocation2 + $0xc]] }
  0x73   : >> { %v729_v49 = vadd.f32 %v727_v27, %v723_v29  ;;  %v797_v52 = vadd.f32 %v795_v31, %v791_v30  ;;  %v801_v53 = vmul.f32 %v800_v37, %v1936_v63  ;;  %v806_v54 = vstv %s2247_s27  ;;  %s2324_s20 = sld [smem:[#allocation2 + $0x30a]] }
  0x74   : >> { %v843_v46 = vmul.f32 %v842_v41, %v1928_v59  ;;  %v844_v2 = vmul.f32 %v842_v41, %v1930_v60  ;;  %v847_v10 = vmul.f32 %v846_v34, %v1932_v61  ;;  %v848_v13 = vmul.f32 %v846_v34, %v1934_v62  ;;  %s2328_s10 = sld [smem:[#allocation2 + $0x389]] }
  0x75   : >> { %v730_v16 = vadd.f32 %v728_v1, %v724_v32  ;;  %v751_v17 = vadd.f32 %v749_v28, %v745_v38  ;;  %v752_v18 = vadd.f32 %v750_v9, %v746_v40  ;;  %v852_v21 = vstv %s2256_s30  ;;  %s2335_s24 = sld [smem:[#allocation2 + $0xe]] }
  0x76   : >> { %v761_v22 = vmul.f32 %v760_v42, %v1986_v43  ;;  %v762_v23 = vmul.f32 %v760_v42, %v1992_v5  ;;  %v798_v24 = vadd.f32 %v796_v48, %v792_v7  ;;  %v802_v59 = vmul.f32 %v800_v37, %v1938_v0  ;;  %s2340_s26 = sld [smem:[#allocation2 + $0x38a]] }
  0x77   : >> { %v767_v60 = vmul.f32 %v766_v4, %v2006_v56  ;;  %v803_v61 = vadd.f32 %v801_v53, %v797_v52  ;;  %v807_v62 = vmul.f32 %v806_v54, %v1946_v11  ;;  %v812_v25 = vstv %s2266_s7  ;;  %s2346_s27 = sld [smem:[#allocation2 + $0x28b]] }
  0x78   : >> { %v849_v33 = vadd.f32 %v847_v10, %v843_v46  ;;  %v850_v39 = vadd.f32 %v848_v13, %v844_v2  ;;  %v853_v51 = vmul.f32 %v852_v21, %v1936_v63  ;;  %v854_v55 = vmul.f32 %v852_v21, %v1938_v0  ;;  %s2351_s30 = sld [smem:[#allocation2 + $0xf]] }
  0x79   : >> { %v757_v27 = vadd.f32 %v755_v35, %v751_v17  ;;  %v758_v1 = vadd.f32 %v756_v36, %v752_v18  ;;  %v768_v28 = vmul.f32 %v766_v4, %v2010_v58  ;;  %v858_v29 = vstv %s2273_s8  ;;  %s2355_s7 = sld [smem:[#allocation2 + $0x30b]] }
  0x7a   : >> { %v2312_v9 = vadd.f32 %v732_v8, %v729_v49  ;;  %v2316_v30 = vadd.f32 %v732_v8, %v730_v16  ;;  %v804_v31 = vadd.f32 %v802_v59, %v798_v24  ;;  %v808_v63 = vmul.f32 %v806_v54, %v1948_v12  ;;  %s2366_s8 = sld [smem:[#allocation2 + $0x10]] }
  0x7b   : >> { %v772_v0 = vstv %s2277_s11  ;;  %v809_v32 = vadd.f32 %v807_v62, %v803_v61  ;;  %v813_v35 = vmul.f32 %v812_v25, %v1986_v43  ;;  %v818_v36 = vstv %s2283_s13  ;;  %s2372_s11 = sld [smem:[#allocation2 + $0x38b]] }
  0x7c   : >> { %v855_v37 = vadd.f32 %v853_v51, %v849_v33  ;;  %v856_v38 = vadd.f32 %v854_v55, %v850_v39  ;;  %v859_v8 = vmul.f32 %v858_v29, %v1946_v11  ;;  %v860_v40 = vmul.f32 %v858_v29, %v1948_v12  ;;  %s2376_s13 = sld [smem:[#allocation2 + $0x11]] }
  0x7d   : >> { %v763_v41 = vadd.f32 %v761_v22, %v757_v27  ;;  %v764_v34 = vadd.f32 %v762_v23, %v758_v1  ;;  %v778_v42 = vstv %s2285_s14  ;;  %v864_v4 = vstv %s2292_s21  ;;  %s2381_s14 = sld [smem:[#allocation2 + $0x8c]] }
  0x7e   : >> { %v773_v7 = vmul.f32 %v772_v0, %v2019_v14  ;;  %v774_v48 = vmul.f32 %v772_v0, %v2023_v15  ;;  %v810_v49 = vadd.f32 %v808_v63, %v804_v31  ;;  %v814_v52 = vmul.f32 %v812_v25, %v1992_v5  ;;  %s2384_s21 = sld [smem:[#allocation2 + $0x8d]] }
  0x7f   : >> { %v815_v53 = vadd.f32 %v813_v35, %v809_v32  ;;  %v819_v11 = vmul.f32 %v818_v36, %v2006_v56  ;;  %v824_v12 = vstv %s2297_s22  ;;  %v870_v54 = vstv %s2302_s23  ;;  %s2388_s22 = sld [smem:[#allocation2 + $0x12]] }
  0x80   : >> { %v861_v46 = vadd.f32 %v859_v8, %v855_v37  ;;  %v862_v2 = vadd.f32 %v860_v40, %v856_v38  ;;  %v865_v10 = vmul.f32 %v864_v4, %v1986_v43  ;;  %v866_v13 = vmul.f32 %v864_v4, %v1992_v5  ;;  %s2392_s23 = sld [smem:[#allocation2 + $0x8e]] }
  0x81   : >> { %v769_v16 = vadd.f32 %v767_v60, %v763_v41  ;;  %v770_v17 = vadd.f32 %v768_v28, %v764_v34  ;;  %v779_v18 = vmul.f32 %v778_v42, %v2030_v19  ;;  %v780_v21 = vmul.f32 %v778_v42, %v2032_v20 }
  0x82   : >> { %v816_v22 = vadd.f32 %v814_v52, %v810_v49  ;;  %v820_v23 = vmul.f32 %v818_v36, %v2010_v58  ;;  %v894_v24 = vstv %s2308_s29  ;;  %v898_v59 = vstv %s2319_s19  ;;  %s2395_s29 = sld [smem:[#allocation2 + $0x18c]] }
  0x83   : >> { %v821_v61 = vadd.f32 %v819_v11, %v815_v53  ;;  %v825_v43 = vmul.f32 %v824_v12, %v2019_v14  ;;  %v830_v5 = vstv %s2324_s20  ;;  %v871_v60 = vmul.f32 %v870_v54, %v2006_v56  ;;  %s2403_s19 = sld [smem:[#allocation2 + $0x18d]] }
  0x84   : >> { %v867_v62 = vadd.f32 %v865_v10, %v861_v46  ;;  %v868_v25 = vadd.f32 %v866_v13, %v862_v2  ;;  %v872_v33 = vmul.f32 %v870_v54, %v2010_v58  ;;  %v876_v39 = vstv %s2328_s10  ;;  %s2408_s20 = sld [smem:[#allocation2 + $0x13]] }
  0x85   : >> { %v895_v51 = vmul.f32 %v894_v24, %v2213_v6  ;;  %v896_v55 = vmul.f32 %v894_v24, %v2217_v45  ;;  %v899_v27 = vmul.f32 %v898_v59, %v2219_v47  ;;  %v900_v1 = vmul.f32 %v898_v59, %v2224_v50  ;;  %s2411_s10 = sld [smem:[#allocation2 + $0x8f]] }
  0x86   : >> { %v775_v28 = vadd.f32 %v773_v7, %v769_v16  ;;  %v822_v29 = vadd.f32 %v820_v23, %v816_v22  ;;  %v826_v31 = vmul.f32 %v824_v12, %v2023_v15  ;;  %v904_v63 = vstv %s2335_s24  ;;  %s2419_s24 = sld [smem:[#allocation2 + $0x18e]] }
  0x87   : >> { %v776_v56 = vadd.f32 %v774_v48, %v770_v17  ;;  %v827_v0 = vadd.f32 %v825_v43, %v821_v61  ;;  %v831_v58 = vmul.f32 %v830_v5, %v2030_v19  ;;  %v882_v32 = vstv %s2340_s26  ;;  %s2426_s26 = sld [smem:[#allocation2 + $0x90]] }
  0x88   : >> { %v873_v35 = vadd.f32 %v871_v60, %v867_v62  ;;  %v874_v36 = vadd.f32 %v872_v33, %v868_v25  ;;  %v877_v37 = vmul.f32 %v876_v39, %v2019_v14  ;;  %v878_v38 = vmul.f32 %v876_v39, %v2023_v15 }
  0x89   : >> { %v901_v8 = vadd.f32 %v899_v27, %v895_v51  ;;  %v902_v40 = vadd.f32 %v900_v1, %v896_v55  ;;  %v905_v41 = vmul.f32 %v904_v63, %v2230_v57  ;;  %v906_v34 = vmul.f32 %v904_v63, %v2232_v44 }
  0x8a   : >> { %v784_v42 = vstv %s2346_s27  ;;  %v828_v4 = vadd.f32 %v826_v31, %v822_v29  ;;  %v832_v7 = vmul.f32 %v830_v5, %v2032_v20  ;;  %v910_v48 = vstv %s2351_s30  ;;  %s2437_s27 = sld [smem:[#allocation2 + $0x18f]] }
  0x8b   : >> { %v781_v14 = vadd.f32 %v779_v18, %v775_v28  ;;  %v782_v15 = vadd.f32 %v780_v21, %v776_v56  ;;  %v833_v49 = vadd.f32 %v831_v58, %v827_v0  ;;  %v836_v52 = vstv %s2355_s7  ;;  %s2446_s30 = sld [smem:[#allocation2 + $0x91]] }
  0x8c   : >> { %v879_v53 = vadd.f32 %v877_v37, %v873_v35  ;;  %v880_v11 = vadd.f32 %v878_v38, %v874_v36  ;;  %v883_v12 = vmul.f32 %v882_v32, %v2030_v19  ;;  %v884_v54 = vmul.f32 %v882_v32, %v2032_v20  ;;  %s2448_s7 = sld [smem:[#allocation2 + $0x14]] }
  0x8d   : >> { %v907_v46 = vadd.f32 %v905_v41, %v901_v8  ;;  %v908_v2 = vadd.f32 %v906_v34, %v902_v40  ;;  %v911_v10 = vmul.f32 %v910_v48, %v2237_v3  ;;  %v912_v13 = vmul.f32 %v910_v48, %v2258_v26 }
  0x8e   : >> { %v834_v16 = vadd.f32 %v832_v7, %v828_v4  ;;  %v916_v17 = vstv %s2366_s8  ;;  %v2398_v19 = vmax.f32 %v2312_v9, 0.0  ;;  %v2401_v20 = vmax.f32 %v2316_v30, 0.0  ;;  %s2456_s8 = sld [smem:[#allocation2 + $0x190]] }
  0x8f   : >> { %v785_v18 = vadd.f32 %v784_v42, %v781_v14  ;;  %v786_v21 = vadd.f32 %v784_v42, %v782_v15  ;;  %v837_v22 = vadd.f32 %v836_v52, %v833_v49  ;;  %v885_v23 = vadd.f32 %v883_v12, %v879_v53 }
  0x90   : >> { %v886_v24 = vadd.f32 %v884_v54, %v880_v11  ;;  %v888_v59 = vstv %s2372_s11  ;;  %v913_v61 = vadd.f32 %v911_v10, %v907_v46  ;;  %v914_v43 = vadd.f32 %v912_v13, %v908_v2  ;;  %s2458_s11 = sld [smem:[#allocation2 + $0x92]] }
  0x91   : >> { %v917_v5 = vmul.f32 %v916_v17, %v2398_v19  ;;  %v918_v9 = vmul.f32 %v916_v17, %v2401_v20  ;;  %v838_v30 = vadd.f32 %v836_v52, %v834_v16  ;;  %v922_v60 = vstv %s2376_s13  ;;  %s2465_s13 = sld [smem:[#allocation2 + $0x93]] }
  0x92   : >> { %v2413_v62 = vmax.f32 %v785_v18, 0.0  ;;  %v2415_v25 = vmax.f32 %v786_v21, 0.0  ;;  %v944_v33 = vstv %s2381_s14  ;;  %v948_v39 = vstv %s2384_s21  ;;  %s2468_s14 = sld [smem:[#allocation2 + $0x10c]] }
  0x93   : >> { %v2421_v51 = vmax.f32 %v837_v22, 0.0  ;;  %v889_v55 = vadd.f32 %v888_v59, %v885_v23  ;;  %v890_v27 = vadd.f32 %v888_v59, %v886_v24  ;;  %v928_v1 = vstv %s2388_s22  ;;  %s2473_s21 = sld [smem:[#allocation2 + $0x191]] }
  0x94   : >> { %v919_v28 = vadd.f32 %v917_v5, %v913_v61  ;;  %v920_v29 = vadd.f32 %v918_v9, %v914_v43  ;;  %v923_v31 = vmul.f32 %v922_v60, %v2413_v62  ;;  %v924_v63 = vmul.f32 %v922_v60, %v2415_v25  ;;  %s2475_s22 = sld [smem:[#allocation2 + $0x10d]] }
  0x95   : >> { %v2428_v56 = vmax.f32 %v838_v30, 0.0  ;;  %v945_v0 = vmul.f32 %v944_v33, %v2213_v6  ;;  %v946_v58 = vmul.f32 %v944_v33, %v2217_v45  ;;  %v949_v32 = vmul.f32 %v948_v39, %v2219_v47 }
  0x96   : >> { %v950_v35 = vmul.f32 %v948_v39, %v2224_v50  ;;  %v954_v36 = vstv %s2392_s23  ;;  %v1044_v37 = vstv %s2395_s29  ;;  %v1048_v38 = vstv %s2403_s19  ;;  %s2479_s23 = sld [smem:[#allocation2 + $0x94]] }
  0x97   : >> { %v2439_v8 = vmax.f32 %v889_v55, 0.0  ;;  %v929_v40 = vmul.f32 %v928_v1, %v2421_v51  ;;  %v930_v41 = vmul.f32 %v928_v1, %v2428_v56  ;;  %v2443_v34 = vmax.f32 %v890_v27, 0.0  ;;  %s2482_s29 = sld [smem:[#allocation2 + $0x10e]] }
  0x98   : >> { %v925_v42 = vadd.f32 %v923_v31, %v919_v28  ;;  %v926_v4 = vadd.f32 %v924_v63, %v920_v29  ;;  %v934_v7 = vstv %s2408_s20  ;;  %v951_v48 = vadd.f32 %v949_v32, %v945_v0  ;;  %s2487_s19 = sld [smem:[#allocation2 + $0x192]] }
  0x99   : >> { %v955_v14 = vmul.f32 %v954_v36, %v2230_v57  ;;  %v1045_v15 = vmul.f32 %v1044_v37, %v2213_v6  ;;  %v1049_v49 = vmul.f32 %v1048_v38, %v2219_v47  ;;  %v952_v52 = vadd.f32 %v950_v35, %v946_v58  ;;  %s2490_s20 = sld [smem:[#allocation2 + $0x10f]] }
  0x9a   : >> { %v956_v53 = vmul.f32 %v954_v36, %v2232_v44  ;;  %v960_v11 = vstv %s2411_s10  ;;  %v1054_v12 = vstv %s2419_s24  ;;  %v1046_v54 = vmul.f32 %v1044_v37, %v2217_v45  ;;  %s2496_s10 = sld [smem:[#allocation2 + $0x110]] }
  0x9b   : >> { %v1050_v46 = vmul.f32 %v1048_v38, %v2224_v50  ;;  %v931_v2 = vadd.f32 %v929_v40, %v925_v42  ;;  %v935_v10 = vmul.f32 %v934_v7, %v2439_v8  ;;  %v936_v13 = vmul.f32 %v934_v7, %v2443_v34  ;;  %s2499_s24 = sld [smem:[#allocation2 + $0x111]] }
  0x9c   : >> { %v966_v16 = vstv %s2426_s26  ;;  %v957_v17 = vadd.f32 %v955_v14, %v951_v48  ;;  %v961_v18 = vmul.f32 %v960_v11, %v2237_v3  ;;  %v1051_v21 = vadd.f32 %v1049_v49, %v1045_v15  ;;  %s2507_s26 = sld [smem:[#allocation2 + $0x193]] }
  0x9d   : >> { %v1055_v22 = vmul.f32 %v1054_v12, %v2230_v57  ;;  %v932_v23 = vadd.f32 %v930_v41, %v926_v4  ;;  %v958_v24 = vadd.f32 %v956_v53, %v952_v52  ;;  %v962_v59 = vmul.f32 %v960_v11, %v2258_v26 }
  0x9e   : >> { %v1060_v61 = vstv %s2437_s27  ;;  %v1052_v43 = vadd.f32 %v1050_v46, %v1046_v54  ;;  %v1056_v5 = vmul.f32 %v1054_v12, %v2232_v44  ;;  %v937_v9 = vadd.f32 %v935_v10, %v931_v2  ;;  %s2511_s27 = sld [smem:[#allocation2 + $0x112]] }
  0x9f   : >> { %v972_v30 = vstv %s2446_s30  ;;  %v963_v60 = vadd.f32 %v961_v18, %v957_v17  ;;  %v967_v33 = vmul.f32 %v966_v16, %v2398_v19  ;;  %v1057_v39 = vadd.f32 %v1055_v22, %v1051_v21  ;;  %s2518_s30 = sld [smem:[#allocation2 + $0x20c]] }
  0xa0   : >> { %v1061_v55 = vmul.f32 %v1060_v61, %v2237_v3  ;;  %v938_v27 = vadd.f32 %v936_v13, %v932_v23  ;;  %v964_v1 = vadd.f32 %v962_v59, %v958_v24  ;;  %v968_v28 = vmul.f32 %v966_v16, %v2401_v20 }
  0xa1   : >> { %v1066_v29 = vstv %s2456_s8  ;;  %v940_v31 = vstv %s2448_s7  ;;  %v1058_v63 = vadd.f32 %v1056_v5, %v1052_v43  ;;  %v1062_v0 = vmul.f32 %v1060_v61, %v2258_v26  ;;  %s2522_s7 = sld [smem:[#allocation2 + $0x20d]] }
  0xa2   : >> { %v973_v58 = vmul.f32 %v972_v30, %v2413_v62  ;;  %v974_v32 = vmul.f32 %v972_v30, %v2415_v25  ;;  %v978_v35 = vstv %s2458_s11  ;;  %v969_v36 = vadd.f32 %v967_v33, %v963_v60  ;;  %s2526_s8 = sld [smem:[#allocation2 + $0x113]] }
  0xa3   : >> { %v994_v37 = vstv %s2468_s14  ;;  %v1063_v38 = vadd.f32 %v1061_v55, %v1057_v39  ;;  %v1067_v40 = vmul.f32 %v1066_v29, %v2398_v19  ;;  %v2502_v41 = vadd.f32 %v940_v31, %v937_v9  ;;  %s2532_s11 = sld [smem:[#allocation2 + $0x194]] }
  0xa4   : >> { %v2504_v42 = vadd.f32 %v940_v31, %v938_v27  ;;  %v970_v4 = vadd.f32 %v968_v28, %v964_v1  ;;  %v1072_v7 = vstv %s2473_s21  ;;  %v984_v48 = vstv %s2465_s13  ;;  %s2538_s13 = sld [smem:[#allocation2 + $0x20e]] }
  0xa5   : >> { %v998_v14 = vstv %s2475_s22  ;;  %v1064_v15 = vadd.f32 %v1062_v0, %v1058_v63  ;;  %v1068_v49 = vmul.f32 %v1066_v29, %v2401_v20  ;;  %v979_v52 = vmul.f32 %v978_v35, %v2421_v51  ;;  %s2542_s14 = sld [smem:[#allocation2 + $0x20f]] }
  0xa6   : >> { %v980_v53 = vmul.f32 %v978_v35, %v2428_v56  ;;  %v995_v11 = vmul.f32 %v994_v37, %v2213_v6  ;;  %v996_v12 = vmul.f32 %v994_v37, %v2217_v45  ;;  %v975_v54 = vadd.f32 %v973_v58, %v969_v36  ;;  %s2545_s21 = sld [smem:[#allocation2 + $0x210]] }
  0xa7   : >> { %v1004_v46 = vstv %s2482_s29  ;;  %v1069_v2 = vadd.f32 %v1067_v40, %v1063_v38  ;;  %v1073_v10 = vmul.f32 %v1072_v7, %v2413_v62  ;;  %v976_v13 = vadd.f32 %v974_v32, %v970_v4  ;;  %s2550_s22 = sld [smem:[#allocation2 + $0x28c]] }
  0xa8   : >> { %v999_v16 = vmul.f32 %v998_v14, %v2219_v47  ;;  %v1000_v17 = vmul.f32 %v998_v14, %v2224_v50  ;;  %v1078_v18 = vstv %s2487_s19  ;;  %v985_v21 = vmul.f32 %v984_v48, %v2439_v8  ;;  %s2564_s29 = sld [smem:[#allocation2 + $0x211]] }
  0xa9   : >> { %v986_v22 = vmul.f32 %v984_v48, %v2443_v34  ;;  %v1070_v23 = vadd.f32 %v1068_v49, %v1064_v15  ;;  %v1074_v24 = vmul.f32 %v1072_v7, %v2415_v25  ;;  %v990_v59 = vstv %s2479_s23  ;;  %s2560_s23 = sld [smem:[#allocation2 + $0x28d]] }
  0xaa   : >> { %v1005_v61 = vmul.f32 %v1004_v46, %v2230_v57  ;;  %v1010_v43 = vstv %s2490_s20  ;;  %v1016_v5 = vstv %s2496_s10  ;;  %v981_v9 = vadd.f32 %v979_v52, %v975_v54  ;;  %s2572_s19 = sld [smem:[#allocation2 + $0x212]] }
  0xab   : >> { %v1006_v30 = vmul.f32 %v1004_v46, %v2232_v44  ;;  %v1075_v60 = vadd.f32 %v1073_v10, %v1069_v2  ;;  %v1079_v33 = vmul.f32 %v1078_v18, %v2421_v51  ;;  %v982_v39 = vadd.f32 %v980_v53, %v976_v13  ;;  %s2578_s20 = sld [smem:[#allocation2 + $0x28e]] }
  0xac   : >> { %v1001_v55 = vadd.f32 %v999_v16, %v995_v11  ;;  %v1002_v27 = vadd.f32 %v1000_v17, %v996_v12  ;;  %v1084_v1 = vstv %s2507_s26  ;;  %v1011_v28 = vmul.f32 %v1010_v43, %v2237_v3  ;;  %s2592_s10 = sld [smem:[#allocation2 + $0x28f]] }
  0xad   : >> { %v1012_v29 = vmul.f32 %v1010_v43, %v2258_v26  ;;  %v1076_v31 = vadd.f32 %v1074_v24, %v1070_v23  ;;  %v1080_v63 = vmul.f32 %v1078_v18, %v2428_v56  ;;  %v2553_v0 = vmul.f32 %v1016_v5, %v2398_v19  ;;  %s2601_s26 = sld [smem:[#allocation2 + $0x30d]] }
  0xae   : >> { %v2556_v58 = vmul.f32 %v1016_v5, %v2401_v20  ;;  %v1022_v32 = vstv %s2499_s24  ;;  %v1094_v35 = vstv %s2518_s30  ;;  %v987_v36 = vadd.f32 %v985_v21, %v981_v9  ;;  %s2597_s24 = sld [smem:[#allocation2 + $0x30c]] }
  0xaf   : >> { %v1081_v37 = vadd.f32 %v1079_v33, %v1075_v60  ;;  %v1085_v38 = vmul.f32 %v1084_v1, %v2439_v8  ;;  %v1098_v40 = vstv %s2522_s7  ;;  %v988_v4 = vadd.f32 %v986_v22, %v982_v39  ;;  %s2615_s30 = sld [smem:[#allocation2 + $0x290]] }
  0xb0   : >> { %v1007_v7 = vadd.f32 %v1005_v61, %v1001_v55  ;;  %v1008_v48 = vadd.f32 %v1006_v30, %v1002_v27  ;;  %v1028_v14 = vstv %s2511_s27  ;;  %v2568_v15 = vmul.f32 %v1022_v32, %v2413_v62  ;;  %s2620_s7 = sld [smem:[#allocation2 + $0x30e]] }
  0xb1   : >> { %v1082_v49 = vadd.f32 %v1080_v63, %v1076_v31  ;;  %v1086_v52 = vmul.f32 %v1084_v1, %v2443_v34  ;;  %v1095_v53 = vmul.f32 %v1094_v35, %v2213_v6  ;;  %v1096_v11 = vmul.f32 %v1094_v35, %v2217_v45  ;;  %s2777_s27 = sld [smem:[#allocation2 + $0x114]] }
  0xb2   : >> { %v1099_v12 = vmul.f32 %v1098_v40, %v2219_v47  ;;  %v1100_v54 = vmul.f32 %v1098_v40, %v2224_v50  ;;  %v1104_v46 = vstv %s2538_s13  ;;  %v991_v2 = vadd.f32 %v990_v59, %v987_v36  ;;  %s2639_s13 = sld [smem:[#allocation2 + $0x291]] }
  0xb3   : >> { %v2581_v10 = vmul.f32 %v1022_v32, %v2415_v25  ;;  %v2586_v13 = vmul.f32 %v1028_v14, %v2421_v51  ;;  %v1087_v16 = vadd.f32 %v1085_v38, %v1081_v37  ;;  %v992_v17 = vadd.f32 %v990_v59, %v988_v4 }
  0xb4   : >> { %v2588_v18 = vadd.f32 %v1011_v28, %v1007_v7  ;;  %v1090_v21 = vstv %s2532_s11  ;;  %v1110_v22 = vstv %s2542_s14  ;;  %v1088_v23 = vadd.f32 %v1086_v52, %v1082_v49  ;;  %s2625_s11 = sld [smem:[#allocation2 + $0x213]] }
  0xb5   : >> { %v1105_v24 = vmul.f32 %v1104_v46, %v2230_v57  ;;  %v1106_v61 = vmul.f32 %v1104_v46, %v2232_v44  ;;  %v1116_v43 = vstv %s2545_s21  ;;  %v1101_v5 = vadd.f32 %v1099_v12, %v1095_v53  ;;  %s2721_s14 = sld [smem:[#allocation2 + $0x313]] }
  0xb6   : >> { %v1102_v9 = vadd.f32 %v1100_v54, %v1096_v11  ;;  %v1144_v59 = vstv %s2550_s22  ;;  %v1148_v30 = vstv %s2560_s23  ;;  %v2603_v60 = vadd.f32 %v1012_v29, %v1008_v48  ;;  %s2647_s22 = scalar_lea.vmem %s313_s12, %s1821_s17  ;;  %s2653_s23 = sld [smem:[#allocation2 + $0x30f]] }
  0xb7   : >> { %v1034_v33 = vstv %s2526_s8  ;;  %v1091_v39 = vadd.f32 %v1090_v21, %v1087_v16  ;;  %v1122_v55 = vstv %s2564_s29  ;;  %v1111_v27 = vmul.f32 %v1110_v22, %v2237_v3  ;;  %s2729_s21 = sld [smem:[#allocation2 + $0x214]] }
  0xb8   : >> { %v1112_v1 = vmul.f32 %v1110_v22, %v2258_v26  ;;  %v2610_v28 = vmul.f32 %v1116_v43, %v2398_v19  ;;  %v2613_v31 = vmul.f32 %v1116_v43, %v2401_v20  ;;  %v1092_v63 = vadd.f32 %v1090_v21, %v1088_v23 }
  0xb9   : >> { %v1128_v32 = vstv %s2572_s19  ;;  %v1145_v29 = vmul.f32 %v1144_v59, %v2213_v6  ;;  %v1149_v35 = vmul.f32 %v1148_v30, %v2219_v47  ;;  %v1107_v36 = vadd.f32 %v1105_v24, %v1101_v5 }
  0xba   : >> { %v1108_v37 = vadd.f32 %v1106_v61, %v1102_v9  ;;  %v2623_v38 = vmul.f32 %v1122_v55, %v2413_v62  ;;  %v1154_v40 = vstv %s2578_s20  ;;  %v2629_v4 = vmul.f32 %v1122_v55, %v2415_v25  ;;  %v2656_v9 = vld [vmem:[%s2647_s22] sm:$0xff]  ;;  %s2667_s20 = scalar_lea.vmem %s306_s9, %s1821_s17 }
  0xbb   : >> { %v1245_v7 = vand.u32 2147483647, %v991_v2  ;;  %v1246_v48 = vand.u32 2147483647, %v992_v17  ;;  %v1614_v49 = vclamps-f32 %v1091_v39, 20.0  ;;  %v2632_v52 = vmul.f32 %v1128_v32, %v2421_v51 }
  0xbc   : >> { %v2635_v53 = vmul.f32 %v1128_v32, %v2428_v56  ;;  %v1146_v11 = vmul.f32 %v1144_v59, %v2217_v45  ;;  %v1150_v12 = vmul.f32 %v1148_v30, %v2224_v50  ;;  %v1151_v54 = vadd.f32 %v1149_v35, %v1145_v29 }
  0xbd   : >> { %v1155_v46 = vmul.f32 %v1154_v40, %v2230_v57  ;;  %v1160_v2 = vstv %s2592_s10  ;;  %v1247_v16 = vmin.f32 %v1245_v7, 20.0  ;;  %v1194_v17 = vstv %s2597_s24  ;;  %s2669_s10 = sld [smem:[#allocation2 + $0x292]] }
  0xbe   : >> { %v1198_v21 = vstv %s2601_s26  ;;  %v1615_v22 = vclamps-f32 %v1092_v63, 20.0  ;;  %v1261_v23 = vmul.f32 0.01, %v1614_v49  ;;  %v1113_v24 = vadd.f32 %v1111_v27, %v1107_v36  ;;  %s2676_s24 = sld [smem:[#allocation2 + $0x310]] }
  0xbf   : >> { %v1114_v61 = vadd.f32 %v1112_v1, %v1108_v37  ;;  %v1248_v43 = vmin.f32 %v1246_v48, 20.0  ;;  %v1265_v5 = vmul.f32 0.01, %v1247_v16  ;;  %v1152_v59 = vadd.f32 %v1150_v12, %v1146_v11  ;;  %s2689_s26 = sld [smem:[#allocation2 + $0x293]] }
  0xc0   : >> { %v1156_v30 = vmul.f32 %v1154_v40, %v2232_v44  ;;  %v1161_v39 = vmul.f32 %v1160_v2, %v2237_v3  ;;  %v1166_v55 = vstv %s2615_s30  ;;  %v1157_v27 = vadd.f32 %v1155_v46, %v1151_v54  ;;  %s2695_s30 = sld [smem:[#allocation2 + $0x311]] }
  0xc1   : >> { %v1195_v1 = vmul.f32 %v1194_v17, %v2213_v6  ;;  %v1199_v63 = vmul.f32 %v1198_v21, %v2219_v47  ;;  %v1204_v32 = vstv %s2620_s7  ;;  %v1196_v29 = vmul.f32 %v1194_v17, %v2217_v45  ;;  %v2683_v6 = vld [vmem:[%s2647_s22 + $0x8] sm:$0xff]  ;;  %v343_v47 = vld [vmem:[%s2667_s20] sm:$0xff]  ;;  %s2709_s7 = sld [smem:[#allocation2 + $0x312]] }
  0xc2   : >> { %v1200_v35 = vmul.f32 %v1198_v21, %v2224_v50  ;;  %v1262_v36 = vmul.f32 0.01, %v1615_v22  ;;  %v1263_v37 = vadd.f32 1.0, %v1261_v23  ;;  %v1134_v40 = vstv %s2625_s11  ;;  %s2746_s22 = sld [smem:[#allocation2 + $0x314]] }
  0xc3   : >> { %v1266_v7 = vmul.f32 0.01, %v1248_v43  ;;  %v1267_v48 = vadd.f32 0.8, %v1265_v5  ;;  %v2680_v49 = vand.u32 2147483647, %v2656_v9  ;;  %v1158_v11 = vadd.f32 %v1156_v30, %v1152_v59 }
  0xc4   : >> { %v1162_v12 = vmul.f32 %v1160_v2, %v2258_v26  ;;  %v1167_v45 = vmul.f32 %v1166_v55, %v2398_v19  ;;  %v1172_v50 = vstv %s2639_s13  ;;  %v1163_v54 = vadd.f32 %v1161_v39, %v1157_v27  ;;  %v344_v30 = vld [vmem:[%s2667_s20 + $0x8] sm:$0xff]  ;;  %s2716_s13 = sld [smem:[#allocation2 + $0x294]] }
  0xc5   : >> { %v1201_v46 = vadd.f32 %v1199_v63, %v1195_v1  ;;  %v1205_v16 = vmul.f32 %v1204_v32, %v2230_v57  ;;  %1704 = vlog2.f32 %v2680_v49  ;;  %v1202_v17 = vadd.f32 %v1200_v35, %v1196_v29 }
  0xc6   : >> { %v1206_v21 = vmul.f32 %v1204_v32, %v2232_v44  ;;  %v1210_v22 = vstv %s2653_s23  ;;  %v1264_v2 = vadd.f32 1.0, %v1262_v36  ;;  %v1268_v23 = vadd.f32 0.8, %v1266_v7  ;;  %s1310_s23 = scalar_lea.vmem %s320_s15, %s1821_s17 }
  0xc7   : >> { %v1269_v43 = vmul.f32 2.0, %v1267_v48  ;;  %v1273_v5 = vmul.f32 %v1263_v37, %v343_v47  ;;  %v2698_v59 = vand.u32 2147483647, %v2683_v6  ;;  %v1119_v57 = vadd.f32 %v2610_v28, %v1113_v24 }
  0xc8   : >> { %v1164_v39 = vadd.f32 %v1162_v12, %v1158_v11  ;;  %v1168_v27 = vmul.f32 %v1166_v55, %v2401_v20  ;;  %v1173_v1 = vmul.f32 %v1172_v50, %v2413_v62  ;;  %v1178_v44 = vstv %s2669_s10 }
  0xc9   : >> { %v1207_v63 = vadd.f32 %v1205_v16, %v1201_v46  ;;  %v1211_v32 = vmul.f32 %v1210_v22, %v2237_v3  ;;  %1706 = vlog2.f32 %v2698_v59  ;;  %v1169_v29 = vadd.f32 %v1167_v45, %v1163_v54 }
  0xca   : >> { %v1208_v35 = vadd.f32 %v1206_v21, %v1202_v17  ;;  %v1212_v36 = vmul.f32 %v1210_v22, %v2258_v26  ;;  %v1216_v37 = vstv %s2676_s24  ;;  %v1270_v24 = vmul.f32 2.0, %v1268_v23 }
  0xcb   : >> { %v1705_v28 = vpop.eup %1704  ;;  %v1271_v55 = vsub.f32 0.0, %v1269_v43  ;;  %v1274_v7 = vmul.f32 %v1264_v2, %v344_v30  ;;  %v1275_v48 = vsub.f32 %v2656_v9, %v1273_v5  ;;  %v1120_v47 = vadd.f32 %v2613_v31, %v1114_v61 }
  0xcc   : >> { %v1174_v3 = vmul.f32 %v1172_v50, %v2415_v25  ;;  %v1184_v11 = vstv %s2689_s26  ;;  %v1635_v12 = vmul.f32 -0.33333334, %v1705_v28  ;;  %v1170_v45 = vadd.f32 %v1168_v27, %v1164_v39 }
  0xcd   : >> { %v1179_v54 = vmul.f32 %v1178_v44, %v2421_v51  ;;  %v1213_v26 = vadd.f32 %v1211_v32, %v1207_v63  ;;  %v1217_v46 = vmul.f32 %v1216_v37, %v2398_v19  ;;  %v1175_v16 = vadd.f32 %v1173_v1, %v1169_v29 }
  0xce   : >> { %v1218_v17 = vmul.f32 %v1216_v37, %v2401_v20  ;;  %v1222_v21 = vstv %s2695_s30  ;;  %1708 = vpow2.f32 %v1635_v12  ;;  %v1214_v61 = vadd.f32 %v1212_v36, %v1208_v35 }
  0xcf   : >> { %v1707_v31 = vpop.eup %1706  ;;  %v1272_v50 = vsub.f32 0.0, %v1270_v24  ;;  %v1276_v22 = vsub.f32 %v2683_v6, %v1274_v7  ;;  %v1277_v2 = vmul.f32 %v1275_v48, %v1271_v55  ;;  %v1125_v23 = vadd.f32 %v2623_v38, %v1119_v57 }
  0xd0   : >> { %v1126_v43 = vadd.f32 %v2629_v4, %v1120_v47  ;;  %v1135_v19 = vmul.f32 %v1134_v40, %v2439_v8  ;;  %v1659_v20 = vmul.f32 -0.33333334, %v1707_v31  ;;  %v1180_v5 = vmul.f32 %v1178_v44, %v2428_v56 }
  0xd1   : >> { %v1185_v30 = vmul.f32 %v1184_v11, %v2439_v8  ;;  %v1219_v39 = vadd.f32 %v1217_v46, %v1213_v26  ;;  %v1223_v27 = vmul.f32 %v1222_v21, %v2413_v62  ;;  %v1176_v1 = vadd.f32 %v1174_v3, %v1170_v45 }
  0xd2   : >> { %v1181_v63 = vadd.f32 %v1179_v54, %v1175_v16  ;;  %v1228_v38 = vstv %s2709_s7  ;;  %1710 = vpow2.f32 %v1659_v20  ;;  %v1220_v4 = vadd.f32 %v1218_v17, %v1214_v61 }
  0xd3   : >> { %v1224_v57 = vmul.f32 %v1222_v21, %v2415_v25  ;;  %v1278_v32 = vmul.f32 %v1276_v22, %v1272_v50  ;;  %v1279_v29 = vmul.f32 1.442695, %v1277_v2  ;;  %v1131_v36 = vadd.f32 %v2632_v52, %v1125_v23 }
  0xd4   : >> { %v1709_v35 = vpop.eup %1708  ;;  %v1132_v44 = vadd.f32 %v2635_v53, %v1126_v43  ;;  %v1136_v37 = vmul.f32 %v1134_v40, %v2443_v34  ;;  %v1186_v62 = vmul.f32 %v1184_v11, %v2443_v34  ;;  %v1190_v28 = vstv %s2716_s13 }
  0xd5   : >> { %v1225_v24 = vadd.f32 %v1223_v27, %v1219_v39  ;;  %v1229_v55 = vmul.f32 %v1228_v38, %v2421_v51  ;;  %v1637_v7 = vmul.f32 %v1709_v35, %v1709_v35  ;;  %v1182_v48 = vadd.f32 %v1180_v5, %v1176_v1 }
  0xd6   : >> { %v1187_v25 = vadd.f32 %v1185_v30, %v1181_v63  ;;  %v1230_v47 = vmul.f32 %v1228_v38, %v2428_v56  ;;  %v1234_v3 = vstv %s2721_s14  ;;  %v1226_v52 = vadd.f32 %v1224_v57, %v1220_v4 }
  0xd7   : >> { %1712 = vpow2.f32 %v1279_v29  ;;  %v1281_v53 = vmul.f32 1.442695, %v1278_v32  ;;  %v1638_v40 = vmul.f32 %v1637_v7, %v2680_v49  ;;  %v1019_v11 = vadd.f32 %v2553_v0, %v2588_v18 }
  0xd8   : >> { %v1711_v12 = vpop.eup %1710  ;;  %v1137_v45 = vadd.f32 %v1135_v19, %v1131_v36  ;;  %v1138_v51 = vadd.f32 %v1136_v37, %v1132_v44  ;;  %v1140_v54 = vstv %s2729_s21  ;;  %v1231_v26 = vadd.f32 %v1229_v55, %v1225_v24 }
  0xd9   : >> { %v1235_v46 = vmul.f32 %v1234_v3, %v2439_v8  ;;  %v1639_v16 = vmul.f32 %v1638_v40, %v1637_v7  ;;  %v1661_v17 = vmul.f32 %v1711_v12, %v1711_v12  ;;  %v1020_v21 = vadd.f32 %v2556_v58, %v2603_v60 }
  0xda   : >> { %v1188_v31 = vadd.f32 %v1186_v62, %v1182_v48  ;;  %v1191_v61 = vadd.f32 %v1190_v28, %v1187_v25  ;;  %v1236_v50 = vmul.f32 %v1234_v3, %v2443_v34  ;;  %v1232_v22 = vadd.f32 %v1230_v47, %v1226_v52 }
  0xdb   : >> { %1714 = vpow2.f32 %v1281_v53  ;;  %v1640_v0 = vsub.f32 %v1639_v16, %v1709_v35  ;;  %v1662_v18 = vmul.f32 %v1661_v17, %v2698_v59  ;;  %v1025_v2 = vadd.f32 %v2568_v15, %v1019_v11 }
  0xdc   : >> { %v1030_v23 = vmul.f32 %v1028_v14, %v2428_v56  ;;  %v2764_v43 = vmul.f32 %v1034_v33, %v2439_v8  ;;  %v1141_v58 = vadd.f32 %v1140_v54, %v1137_v45  ;;  %v1142_v19 = vadd.f32 %v1140_v54, %v1138_v51 }
  0xdd   : >> { %v1713_v60 = vpop.eup %1712  ;;  %v1237_v20 = vadd.f32 %v1235_v46, %v1231_v26  ;;  %v1641_v5 = vmul.f32 -0.33333334, %v1640_v0  ;;  %v1663_v30 = vmul.f32 %v1662_v18, %v1661_v17  ;;  %v1026_v39 = vadd.f32 %v2581_v10, %v1020_v21 }
  0xde   : >> { %v1192_v27 = vadd.f32 %v1190_v28, %v1188_v31  ;;  %v1240_v1 = vstv %s2746_s22  ;;  %v1255_v63 = vand.u32 2147483647, %v1191_v61  ;;  %v1238_v38 = vadd.f32 %v1236_v50, %v1232_v22 }
  0xdf   : >> { %v1243_v15 = vand.u32 2147483647, %v2502_v41  ;;  %v1642_v4 = vadd.f32 %v1709_v35, %v1641_v5  ;;  %v1664_v56 = vsub.f32 %v1663_v30, %v1711_v12  ;;  %v1031_v14 = vadd.f32 %v2586_v13, %v1025_v2 }
  0xe0   : >> { %v1244_v8 = vand.u32 2147483647, %v2504_v42  ;;  %v1253_v57 = vmul.f32 0.001, %v1141_v58  ;;  %v1283_v32 = vsub.f32 1.0, %v1713_v60  ;;  %v1241_v36 = vadd.f32 %v1240_v1, %v1237_v20 }
  0xe1   : >> { %v1715_v29 = vpop.eup %1714  ;;  %v1254_v44 = vmul.f32 0.001, %v1142_v19  ;;  %v1643_v37 = vmul.f32 %v1642_v4, %v2656_v9  ;;  %v1665_v10 = vmul.f32 -0.33333334, %v1664_v56  ;;  %v1256_v62 = vand.u32 2147483647, %v1192_v27 }
  0xe2   : >> { %v1257_v28 = vmul.f32 0.001, %v1255_v63  ;;  %vm1645_vm0 = vweird.f32 %v2680_v49  ;;  %v1648_v41 = vand.u32 2147483648, %v2656_v9  ;;  %v1242_v35 = vadd.f32 %v1240_v1, %v1238_v38 }
  0xe3   : >> { %v1644_v24 = vmul.f32 %v1643_v37, %v1642_v4  ;;  %vm1647_vm1 = vcmp.eq.f32.partialorder %v2680_v49, 0.0  ;;  %v1666_v13 = vadd.f32 %v1711_v12, %v1665_v10  ;;  %v1284_v42 = vsub.f32 1.0, %v1715_v29 }
  0xe4   : >> { %vm1629_vm2 = vcmp.eq.f32.partialorder %v2656_v9, 0.0  ;;  %vm1630_vm3 = vcmp.lt.f32.partialorder %v2656_v9, 0.0  ;;  %v1287_v55 = vmul.f32 %v1283_v32, %v1283_v32  ;;  %v1259_v7 = vmul.f32 0.001, %v1241_v36 }
  0xe5   : >> { %vm1632_vm4 = vcmp.eq.f32.partialorder %v2680_v49, inf  ;;  %v1646_v48 = vsel %vm1645_vm0, %v2656_v9, %v1644_v24  ;;  %v1667_v25 = vmul.f32 %v1666_v13, %v2683_v6  ;;  %vm1669_vm5 = vweird.f32 %v2698_v59 }
  0xe6   : >> { %v1649_v47 = vsel %vm1647_vm1, %v1648_v41, %v1646_v48  ;;  %v1672_v3 = vand.u32 2147483648, %v2683_v6  ;;  %v1295_v52 = vmul.f32 %v2656_v9, %v2656_v9  ;;  %v1260_v53 = vmul.f32 0.001, %v1242_v35 }
  0xe7   : >> { %v1650_v40 = vsel %vm1630_vm3, nan, %v1649_v47  ;;  %v1668_v12 = vmul.f32 %v1667_v25, %v1666_v13  ;;  %vm1671_vm6 = vcmp.eq.f32.partialorder %v2698_v59, 0.0  ;;  %vm1654_vm7 = vcmp.lt.f32.partialorder %v2683_v6, 0.0 }
  0xe8   : >> { %v1651_v49 = vsel %vm1629_vm2, 0.0, %v1650_v40  ;;  %v1288_v11 = vmul.f32 %v1284_v42, %v1284_v42  ;;  %v1289_v45 = vmul.f32 %v1287_v55, %v1243_v15  ;;  %vm1653_vm8 = vcmp.eq.f32.partialorder %v2683_v6, 0.0 }
  0xe9   : >> { %v1652_v51 = vsel %vm1632_vm4, inf, %v1651_v49  ;;  %vm1656_vm9 = vcmp.eq.f32.partialorder %v2698_v59, inf  ;;  %v1670_v54 = vsel %vm1669_vm5, %v2683_v6, %v1668_v12  ;;  %v1296_v16 = vmul.f32 %v2683_v6, %v2683_v6 }
  0xea   : >> { %v1673_v26 = vsel %vm1671_vm6, %v1672_v3, %v1670_v54  ;;  %v1291_v46 = vmul.f32 %v1652_v51, %v1253_v57  ;;  %v1297_v17 = vmul.f32 %v1295_v52, %v1259_v7  ;;  %v1032_v21 = vadd.f32 %v1030_v23, %v1026_v39 }
  0xeb   : >> { %v1036_v31 = vmul.f32 %v1034_v33, %v2443_v34  ;;  %v1674_v61 = vsel %vm1654_vm7, nan, %v1673_v26  ;;  %v1037_v50 = vadd.f32 %v2764_v43, %v1031_v14  ;;  %v1290_v0 = vmul.f32 %v1288_v11, %v1244_v8 }
  0xec   : >> { %v1675_v22 = vsel %vm1653_vm8, 0.0, %v1674_v61  ;;  %v1293_v59 = vadd.f32 %v1291_v46, %v1289_v45  ;;  %v1040_v18 = vstv %s2777_s27  ;;  %v1258_v2 = vmul.f32 0.001, %v1256_v62 }
  0xed   : >> { %v1676_v58 = vsel %vm1656_vm9, inf, %v1675_v22  ;;  %v1298_v19 = vmul.f32 %v1296_v16, %v1260_v53  ;;  %v1303_v5 = vmul.f32 %v1257_v28, %v2656_v9  ;;  %v1038_v23 = vadd.f32 %v1036_v31, %v1032_v21 }
  0xee   : >> { %v1292_v60 = vmul.f32 %v1676_v58, %v1254_v44  ;;  %v1299_v20 = vadd.f32 %v1297_v17, %v1293_v59  ;;  %v1041_v30 = vadd.f32 %v1040_v18, %v1037_v50  ;;  %v1304_v43 = vmul.f32 %v1258_v2, %v2683_v6 }
  0xef   : >> { %v1042_v1 = vadd.f32 %v1040_v18, %v1038_v23 }
  0xf0   : >> { %v1294_v39 = vadd.f32 %v1292_v60, %v1290_v0  ;;  %v1301_v34 = vmin.f32 %v1299_v20, 10.0 }
  0xf2   : >> { %v1300_v33 = vadd.f32 %v1298_v19, %v1294_v39  ;;  %v1305_v27 = vsub.f32 %v1301_v34, %v1303_v5 }
  0xf4   : >> { %v1302_v63 = vmin.f32 %v1300_v33, 10.0  ;;  %v1307_v38 = vadd.f32 %v1305_v27, %v1041_v30 }
  0xf6   : >> { %v1306_v15 = vsub.f32 %v1302_v63, %v1304_v43  ;;  %1311 = vst [vmem:[%s1310_s23] sm:$0xff] %v1307_v38  ;;  %326 = sbr.rel (!%p324_p7) target bundleno = 23 (0x17), region = 96 }
  0xf8   : >> { %v1308_v4 = vadd.f32 %v1306_v15, %v1042_v1 }
  0xfa   : >> { %1312 = vst [vmem:[%s1310_s23 + $0x8] sm:$0xff] %v1308_v4 }
  0xfb PF: > { %s16_s18 = sadd.s32 1, %s1745_s18  }
  0xfc   : > { %p13_p8 = scmp.ge.s32.totalorder %s16_s18, 4  }
  0xfe   :  { %15 = sbr.rel (!%p13_p8) target bundleno = 1 (0x1), region = 107 }
 0x103   :  { %1337 = vsyncpa [#allocation3], 1 }
 0x104   :  { %1339 = vsyncpa [#allocation3 + $0x1], 1 }

</bundles_post_ra>
